<compile_context>
chip_gen: v5e
topology: v5e:2x2
jax: 0.10.0
libtpu: 0.0.40
codegen_flags: <defaults>
</compile_context>

<pallas_src>
import functools

import jax
import jax.numpy as jnp
from jax.experimental import pallas as pl
from jax.experimental.pallas import tpu as pltpu


_TM = 256                       # row-tile target (v7x-safe; raise to 512 on v5e/v6e)
_VMEM_LIMIT = 48 * 1024 * 1024  # explicit scoped-VMEM limit (safe on all generations)


def _round_up(x, m):
    return (x + m - 1) // m * m


def _row_tiles(M, target=_TM):
    """Row tile and padded row count (avoid degenerate single-huge-block fallback)."""
    tm = min(target, _round_up(M, 8))
    return tm, _round_up(M, tm)


def _pad_rows(x2d, rows):
    M = x2d.shape[0]
    if rows == M:
        return x2d
    return jnp.pad(x2d, ((0, rows - M), (0, 0)))


def _layernorm_f32(x, g, b):
    mu = jnp.mean(x, axis=-1, keepdims=True)
    xc = x - mu
    var = jnp.mean(xc * xc, axis=-1, keepdims=True)
    return xc * jax.lax.rsqrt(var + 1e-5) * g + b


# ----------------------- fused attention block (grid = (B, heads)) -----------------------

def _attn_head_kernel(x_ref, g_ref, b_ref, wq_ref, wk_ref, wv_ref, wo_ref, bo_ref,
                      xo_ref, aw_ref, xn_ref, acc_ref, *, scale):
    h = pl.program_id(1)

    @pl.when(h == 0)
    def _():
        x = x_ref[...].astype(jnp.float32)                              # (N, D)
        xn = _layernorm_f32(x, g_ref[...].astype(jnp.float32),
                            b_ref[...].astype(jnp.float32))
        xn_ref[...] = xn.astype(jnp.bfloat16)
        acc_ref[...] = jnp.zeros_like(acc_ref)

    xn = xn_ref[...]                                                    # (N, D) bf16
    # Per-head projections; weight slices are bf16 and delivered by BlockSpec.
    q = jnp.dot(xn, wq_ref[...], preferred_element_type=jnp.float32) * scale   # (N, Dh)
    k = jnp.dot(xn, wk_ref[...], preferred_element_type=jnp.float32)
    v = jnp.dot(xn, wv_ref[...], preferred_element_type=jnp.float32)

    # scores + softmax in f32.  TODO(synk): q-row tiling for long sequences.
    s = jax.lax.dot_general(q.astype(jnp.bfloat16), k.astype(jnp.bfloat16),
                            (((1,), (1,)), ((), ())),
                            preferred_element_type=jnp.float32)         # (N, N)
    s = s - jnp.max(s, axis=-1, keepdims=True)
    e = jnp.exp(s)
    p = e * pl.reciprocal(jnp.sum(e, axis=-1, keepdims=True), approx=True)

    o_h = jnp.dot(p.astype(jnp.bfloat16), v.astype(jnp.bfloat16),
                  preferred_element_type=jnp.float32)                   # (N, Dh)
    aw_ref[...] = o_h.astype(aw_ref.dtype)        # 'trans' branch: attn = out (pre-merge)

    # Accumulate the output projection per head (Wout rows for this head).
    acc_ref[...] += jnp.dot(o_h.astype(jnp.bfloat16), wo_ref[...],
                            preferred_element_type=jnp.float32)         # (N, D)

    @pl.when(h == pl.num_programs(1) - 1)
    def _():
        y = acc_ref[...] + bo_ref[...].astype(jnp.float32) + x_ref[...].astype(jnp.float32)
        xo_ref[...] = y.astype(xo_ref.dtype)


def attention_block(x, ln_g, ln_b, wq, wk, wv, wo, b_out):
    """PreNorm(Attention) + residual.  Returns (new_x, per-head attention output)."""
    B, N, D = x.shape
    heads, _, dh = wq.shape
    scale = float(dh) ** -0.5
    kern = functools.partial(_attn_head_kernel, scale=scale)
    return pl.pallas_call(
        kern,
        out_shape=(
            jax.ShapeDtypeStruct((B, N, D), x.dtype),
            jax.ShapeDtypeStruct((B, heads, N, dh), jnp.float32),
        ),
        grid=(B, heads),
        in_specs=[
            pl.BlockSpec((None, N, D), lambda b, h: (b, 0, 0)),     # x[b] (resident over h)
            pl.BlockSpec((1, D), lambda b, h: (0, 0)),              # LN gamma
            pl.BlockSpec((1, D), lambda b, h: (0, 0)),              # LN beta
            pl.BlockSpec((None, D, dh), lambda b, h: (h, 0, 0)),    # Wq[h]  (bf16)
            pl.BlockSpec((None, D, dh), lambda b, h: (h, 0, 0)),    # Wk[h]
            pl.BlockSpec((None, D, dh), lambda b, h: (h, 0, 0)),    # Wv[h]
            pl.BlockSpec((None, dh, D), lambda b, h: (h, 0, 0)),    # Wout rows for head h
            pl.BlockSpec((1, D), lambda b, h: (0, 0)),              # b_out
        ],
        out_specs=(
            pl.BlockSpec((None, N, D), lambda b, h: (b, 0, 0)),             # new x[b]
            pl.BlockSpec((None, None, N, dh), lambda b, h: (b, h, 0, 0)),   # attn "weights"
        ),
        scratch_shapes=[
            pltpu.VMEM((N, D), jnp.bfloat16),   # cached LayerNorm(x)
            pltpu.VMEM((N, D), jnp.float32),    # output-projection accumulator
        ],
        compiler_params=pltpu.CompilerParams(
            dimension_semantics=("parallel", "arbitrary"),
            vmem_limit_bytes=_VMEM_LIMIT),
    )(x, ln_g.reshape(1, D), ln_b.reshape(1, D), wq, wk, wv, wo, b_out.reshape(1, D))


# ------------------------------ fully fused FeedForward ------------------------------

def _ffn_kernel(x_ref, g_ref, b_ref, w1_ref, b1_ref, w2_ref, b2_ref, o_ref):
    x = x_ref[...].astype(jnp.float32)                                   # (tm, D)
    xn = _layernorm_f32(x, g_ref[...].astype(jnp.float32),
                        b_ref[...].astype(jnp.float32))
    h = jnp.dot(xn.astype(jnp.bfloat16), w1_ref[...],
                preferred_element_type=jnp.float32)                      # (tm, mlp)
    h = h + b1_ref[...].astype(jnp.float32)
    h = 0.5 * h * (1.0 + jax.lax.erf(h * 0.7071067811865476))            # exact GELU
    y = jnp.dot(h.astype(jnp.bfloat16), w2_ref[...],
                preferred_element_type=jnp.float32)                      # (tm, D)
    y = y + b2_ref[...].astype(jnp.float32) + x                          # bias + residual
    o_ref[...] = y.astype(o_ref.dtype)


def feed_forward_block(x2d, ln_g, ln_b, w1, b1, w2, b2):
    """PreNorm(FeedForward) + residual, fused in one row-tiled kernel."""
    M, D = x2d.shape
    Hd = w1.shape[1]
    tm, Mp = _row_tiles(M)
    xp = _pad_rows(x2d, Mp)
    out = pl.pallas_call(
        _ffn_kernel,
        out_shape=jax.ShapeDtypeStruct((Mp, D), x2d.dtype),
        grid=(Mp // tm,),
        in_specs=[
            pl.BlockSpec((tm, D), lambda i: (i, 0)),
            pl.BlockSpec((1, D), lambda i: (0, 0)),
            pl.BlockSpec((1, D), lambda i: (0, 0)),
            pl.BlockSpec((D, Hd), lambda i: (0, 0)),    # W1 (bf16, VMEM resident)
            pl.BlockSpec((1, Hd), lambda i: (0, 0)),
            pl.BlockSpec((Hd, D), lambda i: (0, 0)),    # W2 (bf16, VMEM resident)
            pl.BlockSpec((1, D), lambda i: (0, 0)),
        ],
        out_specs=pl.BlockSpec((tm, D), lambda i: (i, 0)),
        compiler_params=pltpu.CompilerParams(
            dimension_semantics=("parallel",),
            vmem_limit_bytes=_VMEM_LIMIT),
    )(xp, ln_g.reshape(1, D), ln_b.reshape(1, D), w1, b1.reshape(1, Hd), w2, b2.reshape(1, D))
    return out[:M] if Mp != M else out


# ------------------------------ small dense helper kernels ------------------------------

def _dense_kernel(x_ref, w_ref, b_ref, o_ref):
    y = jnp.dot(x_ref[...].astype(jnp.bfloat16), w_ref[...],
                preferred_element_type=jnp.float32)
    o_ref[...] = (y + b_ref[...].astype(jnp.float32)).astype(o_ref.dtype)


def dense(x2d, w, b):
    M, K = x2d.shape
    Nf = w.shape[1]
    tm, Mp = _row_tiles(M)
    xp = _pad_rows(x2d, Mp)
    out = pl.pallas_call(
        _dense_kernel,
        out_shape=jax.ShapeDtypeStruct((Mp, Nf), jnp.float32),
        grid=(Mp // tm,),
        in_specs=[pl.BlockSpec((tm, K), lambda i: (i, 0)),
                  pl.BlockSpec((K, Nf), lambda i: (0, 0)),
                  pl.BlockSpec((1, Nf), lambda i: (0, 0))],
        out_specs=pl.BlockSpec((tm, Nf), lambda i: (i, 0)),
        compiler_params=pltpu.CompilerParams(
            dimension_semantics=("parallel",),
            vmem_limit_bytes=_VMEM_LIMIT),
    )(xp, w, b.reshape(1, Nf))
    return out[:M] if Mp != M else out


def _ln_dense_kernel(x_ref, g_ref, b_ref, w_ref, bias_ref, o_ref):
    x = x_ref[...].astype(jnp.float32)
    xn = _layernorm_f32(x, g_ref[...].astype(jnp.float32),
                        b_ref[...].astype(jnp.float32))
    y = jnp.dot(xn.astype(jnp.bfloat16), w_ref[...],
                preferred_element_type=jnp.float32)
    o_ref[...] = (y + bias_ref[...].astype(jnp.float32)).astype(o_ref.dtype)


def ln_dense(x2d, gamma, beta, w, b):
    M, D = x2d.shape
    Nf = w.shape[1]
    tm, Mp = _row_tiles(M)
    xp = _pad_rows(x2d, Mp)
    out = pl.pallas_call(
        _ln_dense_kernel,
        out_shape=jax.ShapeDtypeStruct((Mp, Nf), jnp.float32),
        grid=(Mp // tm,),
        in_specs=[pl.BlockSpec((tm, D), lambda i: (i, 0)),
                  pl.BlockSpec((1, D), lambda i: (0, 0)),
                  pl.BlockSpec((1, D), lambda i: (0, 0)),
                  pl.BlockSpec((D, Nf), lambda i: (0, 0)),
                  pl.BlockSpec((1, Nf), lambda i: (0, 0))],
        out_specs=pl.BlockSpec((tm, Nf), lambda i: (i, 0)),
        compiler_params=pltpu.CompilerParams(
            dimension_semantics=("parallel",),
            vmem_limit_bytes=_VMEM_LIMIT),
    )(xp, gamma.reshape(1, D), beta.reshape(1, D), w, b.reshape(1, Nf))
    return out[:M] if Mp != M else out


# -------------------------------------- model --------------------------------------

def transformer_blocks(x, layers):
    B, N, D = x.shape
    attn_weights = []
    for p in layers:
        x, aw = attention_block(x, p["ln1_g"], p["ln1_b"], p["wq"], p["wk"], p["wv"],
                                p["wo"], p["b_out"])
        attn_weights.append(aw)                              # (B, H, N, Dh) f32
        x2d = x.reshape(B * N, D)
        x = feed_forward_block(x2d, p["ln2_g"], p["ln2_b"], p["w1"], p["b1"],
                               p["w2"], p["b2"]).reshape(B, N, D)
    return x, attn_weights, None                             # cls_indices is None for 'trans'


def init_vit_params(key, *, image_size, patch_size, channels, num_classes,
                    dim, depth, heads, dim_head, mlp_dim):
    num_patches = (image_size // patch_size) ** 2
    patch_dim = channels * patch_size * patch_size
    inner = heads * dim_head

    def uniform(k, shape, fan_in, dtype=jnp.bfloat16):
        bound = 1.0 / float(fan_in) ** 0.5
        return jax.random.uniform(k, shape, jnp.float32, -bound, bound).astype(dtype)

    keys = jax.random.split(key, 6)
    params = {
        "w_patch": uniform(keys[0], (patch_dim, dim), patch_dim),
        "b_patch": uniform(keys[1], (dim,), patch_dim, jnp.float32),
        "pos_embedding": jax.random.normal(keys[2], (1, num_patches + 1, dim), jnp.float32),
        "cls_token": jax.random.normal(keys[3], (1, 1, dim), jnp.float32),
        "head_ln_g": jnp.ones((dim,), jnp.float32),
        "head_ln_b": jnp.zeros((dim,), jnp.float32),
        "w_head": uniform(keys[4], (dim, num_classes), dim),
        "b_head": uniform(keys[5], (num_classes,), dim, jnp.float32),
        "layers": [],
    }

    def per_head_cols(w):   # (dim, inner) -> (heads, dim, dim_head)
        return w.reshape(dim, heads, dim_head).transpose(1, 0, 2)

    for li in range(depth):
        k = jax.random.fold_in(key, 1000 + li)
        ks = jax.random.split(k, 7)
        w_qkv = uniform(ks[0], (dim, 3 * inner), dim)        # to_qkv (no bias), bf16
        wq, wk, wv = jnp.split(w_qkv, 3, axis=1)
        w_out = uniform(ks[1], (inner, dim), inner)          # to_out Linear, bf16
        params["layers"].append(dict(
            ln1_g=jnp.ones((dim,), jnp.float32),
            ln1_b=jnp.zeros((dim,), jnp.float32),
            wq=per_head_cols(wq), wk=per_head_cols(wk), wv=per_head_cols(wv),
            wo=w_out.reshape(heads, dim_head, dim),
            b_out=uniform(ks[2], (dim,), inner, jnp.float32),
            ln2_g=jnp.ones((dim,), jnp.float32),
            ln2_b=jnp.zeros((dim,), jnp.float32),
            w1=uniform(ks[3], (dim, mlp_dim), dim),
            b1=uniform(ks[4], (mlp_dim,), dim, jnp.float32),
            w2=uniform(ks[5], (mlp_dim, dim), mlp_dim),
            b2=uniform(ks[6], (dim,), mlp_dim, jnp.float32),
        ))
    return params


@functools.partial(jax.jit, static_argnums=(2,))
def vit_forward(img, params, patch_size):
    p = patch_size
    B, C, H, W = img.shape
    gh, gw = H // p, W // p
    num_patches = gh * gw
    dim = params["w_patch"].shape[1]

    # Rearrange 'b c (h p1) (w p2) -> b (h w) (p1 p2 c)'  (layout only) + Linear.
    patches = img.reshape(B, C, gh, p, gw, p).transpose(0, 2, 4, 3, 5, 1)
    patches = patches.reshape(B * num_patches, p * p * C)
    x = dense(patches, params["w_patch"], params["b_patch"]).reshape(B, num_patches, dim)

    cls = jnp.broadcast_to(params["cls_token"].astype(x.dtype), (B, 1, dim))
    x = jnp.concatenate([cls, x], axis=1)
    x = x + params["pos_embedding"][:, :num_patches + 1].astype(x.dtype)
    # emb_dropout: identity (inference).

    x, attn_weights, _cls_indices = transformer_blocks(x, params["layers"])

    x_cls = x[:, 0]                                          # pool = 'cls'
    logits = ln_dense(x_cls, params["head_ln_g"], params["head_ln_b"],
                      params["w_head"], params["b_head"])
    return logits, attn_weights


if __name__ == "__main__":
    # Small shapes consistent with the module.
    image_size, patch_size, channels = 16, 8, 3
    num_classes = 10
    dim, depth, heads, dim_head, mlp_dim = 32, 2, 4, 16, 64
    B = 2

    key = jax.random.PRNGKey(0)
    k_img, k_par = jax.random.split(key)
    img = jax.random.normal(k_img, (B, channels, image_size, image_size), jnp.float32)
    params = init_vit_params(k_par, image_size=image_size, patch_size=patch_size,
                             channels=channels, num_classes=num_classes, dim=dim,
                             depth=depth, heads=heads, dim_head=dim_head, mlp_dim=mlp_dim)

    logits, attn_ws = vit_forward(img, params, patch_size)
    jax.block_until_ready(logits)
    for a in attn_ws:
        jax.block_until_ready(a)

    n_tokens = (image_size // patch_size) ** 2 + 1
    assert logits.shape == (B, num_classes)
    assert len(attn_ws) == depth
    assert attn_ws[0].shape == (B, heads, n_tokens, dim_head)
    assert bool(jnp.all(jnp.isfinite(logits)))
    print("KERNEL_OK")
</pallas_src>

<mosaic_0001>
module attributes {stable_mosaic.version = 11 : i64} {
  func.func @_dense_kernel(%arg0: i32, %arg1: memref<8x192xf32, #tpu.memory_space<vmem>>, %arg2: memref<192x32xbf16, #tpu.memory_space<vmem>>, %arg3: memref<1x32xf32, #tpu.memory_space<vmem>>, %arg4: memref<8x32xf32, #tpu.memory_space<vmem>>) attributes {dimension_semantics = [#tpu.dimension_semantics<parallel>], iteration_bounds = array<i64: 1>, scalar_prefetch = 0 : i64, scratch_operands = 0 : i64, tpu.core_type = #tpu.core_type<tc>, window_params = [{transform_indices = @transform_0, window_bounds = array<i64: 8, 192>}, {pipeline_mode = #tpu.pipeline_mode<synchronous>, transform_indices = @transform_1, window_bounds = array<i64: 192, 32>}, {pipeline_mode = #tpu.pipeline_mode<synchronous>, transform_indices = @transform_2, window_bounds = array<i64: 1, 32>}, {transform_indices = @transform_3, window_bounds = array<i64: 8, 32>}]} {
    %c0 = arith.constant 0 : index
    %c0_0 = arith.constant 0 : index
    %0 = vector.load %arg1[%c0, %c0_0] : memref<8x192xf32, #tpu.memory_space<vmem>>, vector<8x192xf32>
    %1 = arith.truncf %0 : vector<8x192xf32> to vector<8x192xbf16>
    %c0_1 = arith.constant 0 : index
    %c0_2 = arith.constant 0 : index
    %2 = vector.load %arg2[%c0_1, %c0_2] : memref<192x32xbf16, #tpu.memory_space<vmem>>, vector<192x32xbf16>
    %cst = arith.constant dense<0.000000e+00> : vector<8x32xf32>
    %3 = tpu.matmul %1, %2, %cst {dimension_numbers = #tpu.dot_dimension_numbers<[1], [0], [0], [1], [0, 0, 1, 1], [], []>} : vector<8x192xbf16>, vector<192x32xbf16>, vector<8x32xf32> -> vector<8x32xf32>
    %c0_3 = arith.constant 0 : index
    %c0_4 = arith.constant 0 : index
    %4 = vector.load %arg3[%c0_3, %c0_4] : memref<1x32xf32, #tpu.memory_space<vmem>>, vector<1x32xf32>
    %5 = vector.broadcast %4 : vector<1x32xf32> to vector<8x32xf32>
    %6 = arith.addf %3, %5 : vector<8x32xf32>
    %c0_5 = arith.constant 0 : index
    %c0_6 = arith.constant 0 : index
    %7 = vector.load %arg4[%c0_5, %c0_6] : memref<8x32xf32, #tpu.memory_space<vmem>>, vector<8x32xf32>
    tpu.vector_store %arg4[%c0_5, %c0_6], %6 {strides = array<i32>} : memref<8x32xf32, #tpu.memory_space<vmem>>, vector<8x32xf32>,
    return
  }
  func.func @transform_0(%arg0: i32) -> (i32, i32) {
    %c0_i32 = arith.constant 0 : i32
    %c0_i32_0 = arith.constant 0 : i32
    return %arg0, %c0_i32 : i32, i32
  }
  func.func @transform_1(%arg0: i32) -> (i32, i32) {
    %c0_i32 = arith.constant 0 : i32
    %c0_i32_0 = arith.constant 0 : i32
    %c0_i32_1 = arith.constant 0 : i32
    return %c0_i32, %c0_i32_0 : i32, i32
  }
  func.func @transform_2(%arg0: i32) -> (i32, i32) {
    %c0_i32 = arith.constant 0 : i32
    %c0_i32_0 = arith.constant 0 : i32
    %c0_i32_1 = arith.constant 0 : i32
    return %c0_i32, %c0_i32_0 : i32, i32
  }
  func.func @transform_3(%arg0: i32) -> (i32, i32) {
    %c0_i32 = arith.constant 0 : i32
    %c0_i32_0 = arith.constant 0 : i32
    return %arg0, %c0_i32 : i32, i32
  }
}

module attributes {stable_mosaic.version = 11 : i64} {
  func.func @_attn_head_kernel(%arg0: i32, %arg1: i32, %arg2: memref<1x5x32xf32, #tpu.memory_space<vmem>>, %arg3: memref<1x32xf32, #tpu.memory_space<vmem>>, %arg4: memref<1x32xf32, #tpu.memory_space<vmem>>, %arg5: memref<1x32x16xbf16, #tpu.memory_space<vmem>>, %arg6: memref<1x32x16xbf16, #tpu.memory_space<vmem>>, %arg7: memref<1x32x16xbf16, #tpu.memory_space<vmem>>, %arg8: memref<1x16x32xbf16, #tpu.memory_space<vmem>>, %arg9: memref<1x32xf32, #tpu.memory_space<vmem>>, %arg10: memref<1x5x32xf32, #tpu.memory_space<vmem>>, %arg11: memref<1x1x5x16xf32, #tpu.memory_space<vmem>>, %arg12: memref<5x32xbf16, #tpu.memory_space<vmem>>, %arg13: memref<5x32xf32, #tpu.memory_space<vmem>>) attributes {dimension_semantics = [#tpu.dimension_semantics<parallel>, #tpu.dimension_semantics<arbitrary>], iteration_bounds = array<i64: 2, 4>, scalar_prefetch = 0 : i64, scratch_operands = 2 : i64, tpu.core_type = #tpu.core_type<tc>, window_params = [{transform_indices = @transform_0, window_bounds = array<i64: 1, 5, 32>}, {pipeline_mode = #tpu.pipeline_mode<synchronous>, transform_indices = @transform_1, window_bounds = array<i64: 1, 32>}, {pipeline_mode = #tpu.pipeline_mode<synchronous>, transform_indices = @transform_2, window_bounds = array<i64: 1, 32>}, {transform_indices = @transform_3, window_bounds = array<i64: 1, 32, 16>}, {transform_indices = @transform_4, window_bounds = array<i64: 1, 32, 16>}, {transform_indices = @transform_5, window_bounds = array<i64: 1, 32, 16>}, {transform_indices = @transform_6, window_bounds = array<i64: 1, 16, 32>}, {pipeline_mode = #tpu.pipeline_mode<synchronous>, transform_indices = @transform_7, window_bounds = array<i64: 1, 32>}, {transform_indices = @transform_8, window_bounds = array<i64: 1, 5, 32>}, {transform_indices = @transform_9, window_bounds = array<i64: 1, 1, 5, 16>}]} {
    %c0_i32 = arith.constant 0 : i32
    %0 = arith.cmpi eq, %arg1, %c0_i32 : i32
    %1 = arith.extui %0 : i1 to i32
    %c0_i32_0 = arith.constant 0 : i32
    %2 = arith.cmpi ne, %1, %c0_i32_0 : i32
    scf.if %2 {
      %c0_31 = arith.constant 0 : index
      %c0_32 = arith.constant 0 : index
      %c0_33 = arith.constant 0 : index
      %44 = vector.load %arg2[%c0_31, %c0_32, %c0_33] : memref<1x5x32xf32, #tpu.memory_space<vmem>>, vector<1x5x32xf32>
      %45 = vector.shape_cast %44 : vector<1x5x32xf32> to vector<5x32xf32>
      %c0_34 = arith.constant 0 : index
      %c0_35 = arith.constant 0 : index
      %46 = vector.load %arg3[%c0_34, %c0_35] : memref<1x32xf32, #tpu.memory_space<vmem>>, vector<1x32xf32>
      %c0_36 = arith.constant 0 : index
      %c0_37 = arith.constant 0 : index
      %47 = vector.load %arg4[%c0_36, %c0_37] : memref<1x32xf32, #tpu.memory_space<vmem>>, vector<1x32xf32>
      %cst_38 = arith.constant dense<0.000000e+00> : vector<5xf32>
      %48 = vector.multi_reduction <add>, %45, %cst_38 [1] : vector<5x32xf32> to vector<5xf32>
      %49 = vector.shape_cast %48 : vector<5xf32> to vector<5x1xf32>
      %cst_39 = arith.constant 3.200000e+01 : f32
      %50 = vector.broadcast %cst_39 : f32 to vector<5x1xf32>
      %51 = arith.divf %49, %50 : vector<5x1xf32>
      %52 = vector.broadcast %51 : vector<5x1xf32> to vector<5x32xf32>
      %53 = arith.subf %45, %52 : vector<5x32xf32>
      %54 = arith.mulf %53, %53 : vector<5x32xf32>
      %cst_40 = arith.constant dense<0.000000e+00> : vector<5xf32>
      %55 = vector.multi_reduction <add>, %54, %cst_40 [1] : vector<5x32xf32> to vector<5xf32>
      %56 = vector.shape_cast %55 : vector<5xf32> to vector<5x1xf32>
      %cst_41 = arith.constant 3.200000e+01 : f32
      %57 = vector.broadcast %cst_41 : f32 to vector<5x1xf32>
      %58 = arith.divf %56, %57 : vector<5x1xf32>
      %cst_42 = arith.constant 9.99999974E-6 : f32
      %59 = vector.broadcast %cst_42 : f32 to vector<5x1xf32>
      %60 = arith.addf %58, %59 : vector<5x1xf32>
      %61 = math.rsqrt %60 : vector<5x1xf32>
      %62 = vector.broadcast %61 : vector<5x1xf32> to vector<5x32xf32>
      %63 = arith.mulf %53, %62 : vector<5x32xf32>
      %64 = vector.broadcast %46 : vector<1x32xf32> to vector<5x32xf32>
      %65 = arith.mulf %63, %64 : vector<5x32xf32>
      %66 = vector.broadcast %47 : vector<1x32xf32> to vector<5x32xf32>
      %67 = arith.addf %65, %66 : vector<5x32xf32>
      %68 = arith.truncf %67 : vector<5x32xf32> to vector<5x32xbf16>
      %c0_43 = arith.constant 0 : index
      %c0_44 = arith.constant 0 : index
      %69 = vector.load %arg12[%c0_43, %c0_44] : memref<5x32xbf16, #tpu.memory_space<vmem>>, vector<5x32xbf16>
      tpu.vector_store %arg12[%c0_43, %c0_44], %68 {strides = array<i32>} : memref<5x32xbf16, #tpu.memory_space<vmem>>, vector<5x32xbf16>,
      %cst_45 = arith.constant 0.000000e+00 : f32
      %70 = vector.broadcast %cst_45 : f32 to vector<5x32xf32>
      %c0_46 = arith.constant 0 : index
      %c0_47 = arith.constant 0 : index
      %71 = vector.load %arg13[%c0_46, %c0_47] : memref<5x32xf32, #tpu.memory_space<vmem>>, vector<5x32xf32>
      tpu.vector_store %arg13[%c0_46, %c0_47], %70 {strides = array<i32>} : memref<5x32xf32, #tpu.memory_space<vmem>>, vector<5x32xf32>,
    } else {
    }
    %c0 = arith.constant 0 : index
    %c0_1 = arith.constant 0 : index
    %3 = vector.load %arg12[%c0, %c0_1] : memref<5x32xbf16, #tpu.memory_space<vmem>>, vector<5x32xbf16>
    %c0_2 = arith.constant 0 : index
    %c0_3 = arith.constant 0 : index
    %c0_4 = arith.constant 0 : index
    %4 = vector.load %arg5[%c0_2, %c0_3, %c0_4] : memref<1x32x16xbf16, #tpu.memory_space<vmem>>, vector<1x32x16xbf16>
    %5 = vector.shape_cast %4 : vector<1x32x16xbf16> to vector<32x16xbf16>
    %cst = arith.constant dense<0.000000e+00> : vector<5x16xf32>
    %6 = tpu.matmul %3, %5, %cst {dimension_numbers = #tpu.dot_dimension_numbers<[1], [0], [0], [1], [0, 0, 1, 1], [], []>} : vector<5x32xbf16>, vector<32x16xbf16>, vector<5x16xf32> -> vector<5x16xf32>
    %cst_5 = arith.constant 2.500000e-01 : f32
    %7 = vector.broadcast %cst_5 : f32 to vector<5x16xf32>
    %8 = arith.mulf %6, %7 : vector<5x16xf32>
    %c0_6 = arith.constant 0 : index
    %c0_7 = arith.constant 0 : index
    %c0_8 = arith.constant 0 : index
    %9 = vector.load %arg6[%c0_6, %c0_7, %c0_8] : memref<1x32x16xbf16, #tpu.memory_space<vmem>>, vector<1x32x16xbf16>
    %10 = vector.shape_cast %9 : vector<1x32x16xbf16> to vector<32x16xbf16>
    %cst_9 = arith.constant dense<0.000000e+00> : vector<5x16xf32>
    %11 = tpu.matmul %3, %10, %cst_9 {dimension_numbers = #tpu.dot_dimension_numbers<[1], [0], [0], [1], [0, 0, 1, 1], [], []>} : vector<5x32xbf16>, vector<32x16xbf16>, vector<5x16xf32> -> vector<5x16xf32>
    %c0_10 = arith.constant 0 : index
    %c0_11 = arith.constant 0 : index
    %c0_12 = arith.constant 0 : index
    %12 = vector.load %arg7[%c0_10, %c0_11, %c0_12] : memref<1x32x16xbf16, #tpu.memory_space<vmem>>, vector<1x32x16xbf16>
    %13 = vector.shape_cast %12 : vector<1x32x16xbf16> to vector<32x16xbf16>
    %cst_13 = arith.constant dense<0.000000e+00> : vector<5x16xf32>
    %14 = tpu.matmul %3, %13, %cst_13 {dimension_numbers = #tpu.dot_dimension_numbers<[1], [0], [0], [1], [0, 0, 1, 1], [], []>} : vector<5x32xbf16>, vector<32x16xbf16>, vector<5x16xf32> -> vector<5x16xf32>
    %15 = arith.truncf %8 : vector<5x16xf32> to vector<5x16xbf16>
    %16 = arith.truncf %11 : vector<5x16xf32> to vector<5x16xbf16>
    %cst_14 = arith.constant dense<0.000000e+00> : vector<5x5xf32>
    %17 = tpu.matmul %15, %16, %cst_14 {dimension_numbers = #tpu.dot_dimension_numbers<[1], [1], [0], [0], [0, 0, 1, 0], [], []>} : vector<5x16xbf16>, vector<5x16xbf16>, vector<5x5xf32> -> vector<5x5xf32>
    %cst_15 = arith.constant dense<0xFF800000> : vector<5xf32>
    %18 = vector.multi_reduction <maximumf>, %17, %cst_15 [1] : vector<5x5xf32> to vector<5xf32>
    %19 = vector.shape_cast %18 : vector<5xf32> to vector<5x1xf32>
    %20 = vector.broadcast %19 : vector<5x1xf32> to vector<5x5xf32>
    %21 = arith.subf %17, %20 : vector<5x5xf32>
    %22 = math.exp %21 : vector<5x5xf32>
    %cst_16 = arith.constant dense<0.000000e+00> : vector<5xf32>
    %23 = vector.multi_reduction <add>, %22, %cst_16 [1] : vector<5x5xf32> to vector<5xf32>
    %24 = vector.shape_cast %23 : vector<5xf32> to vector<5x1xf32>
    %25 = tpu.reciprocal %24 {approx = true} : vector<5x1xf32> -> vector<5x1xf32>
    %26 = vector.broadcast %25 : vector<5x1xf32> to vector<5x5xf32>
    %27 = arith.mulf %22, %26 : vector<5x5xf32>
    %28 = arith.truncf %27 : vector<5x5xf32> to vector<5x5xbf16>
    %29 = arith.truncf %14 : vector<5x16xf32> to vector<5x16xbf16>
    %cst_17 = arith.constant dense<0.000000e+00> : vector<5x16xf32>
    %30 = tpu.matmul %28, %29, %cst_17 {dimension_numbers = #tpu.dot_dimension_numbers<[1], [0], [0], [1], [0, 0, 1, 1], [], []>} : vector<5x5xbf16>, vector<5x16xbf16>, vector<5x16xf32> -> vector<5x16xf32>
    %c0_18 = arith.constant 0 : index
    %c0_19 = arith.constant 0 : index
    %c0_20 = arith.constant 0 : index
    %c0_21 = arith.constant 0 : index
    %31 = vector.load %arg11[%c0_18, %c0_19, %c0_20, %c0_21] : memref<1x1x5x16xf32, #tpu.memory_space<vmem>>, vector<1x1x5x16xf32>
    %32 = vector.shape_cast %31 : vector<1x1x5x16xf32> to vector<5x16xf32>
    %33 = vector.shape_cast %30 : vector<5x16xf32> to vector<1x1x5x16xf32>
    tpu.vector_store %arg11[%c0_18, %c0_19, %c0_20, %c0_21], %33 {strides = array<i32>} : memref<1x1x5x16xf32, #tpu.memory_space<vmem>>, vector<1x1x5x16xf32>,
    %c0_22 = arith.constant 0 : index
    %c0_23 = arith.constant 0 : index
    %34 = vector.load %arg13[%c0_22, %c0_23] : memref<5x32xf32, #tpu.memory_space<vmem>>, vector<5x32xf32>
    %35 = arith.truncf %30 : vector<5x16xf32> to vector<5x16xbf16>
    %c0_24 = arith.constant 0 : index
    %c0_25 = arith.constant 0 : index
    %c0_26 = arith.constant 0 : index
    %36 = vector.load %arg8[%c0_24, %c0_25, %c0_26] : memref<1x16x32xbf16, #tpu.memory_space<vmem>>, vector<1x16x32xbf16>
    %37 = vector.shape_cast %36 : vector<1x16x32xbf16> to vector<16x32xbf16>
    %cst_27 = arith.constant dense<0.000000e+00> : vector<5x32xf32>
    %38 = tpu.matmul %35, %37, %cst_27 {dimension_numbers = #tpu.dot_dimension_numbers<[1], [0], [0], [1], [0, 0, 1, 1], [], []>} : vector<5x16xbf16>, vector<16x32xbf16>, vector<5x32xf32> -> vector<5x32xf32>
    %39 = arith.addf %34, %38 : vector<5x32xf32>
    %c0_28 = arith.constant 0 : index
    %c0_29 = arith.constant 0 : index
    %40 = vector.load %arg13[%c0_28, %c0_29] : memref<5x32xf32, #tpu.memory_space<vmem>>, vector<5x32xf32>
    tpu.vector_store %arg13[%c0_28, %c0_29], %39 {strides = array<i32>} : memref<5x32xf32, #tpu.memory_space<vmem>>, vector<5x32xf32>,
    %c3_i32 = arith.constant 3 : i32
    %41 = arith.cmpi eq, %arg1, %c3_i32 : i32
    %42 = arith.extui %41 : i1 to i32
    %c0_i32_30 = arith.constant 0 : i32
    %43 = arith.cmpi ne, %42, %c0_i32_30 : i32
    scf.if %43 {
      %c0_31 = arith.constant 0 : index
      %c0_32 = arith.constant 0 : index
      %44 = vector.load %arg13[%c0_31, %c0_32] : memref<5x32xf32, #tpu.memory_space<vmem>>, vector<5x32xf32>
      %c0_33 = arith.constant 0 : index
      %c0_34 = arith.constant 0 : index
      %45 = vector.load %arg9[%c0_33, %c0_34] : memref<1x32xf32, #tpu.memory_space<vmem>>, vector<1x32xf32>
      %46 = vector.broadcast %45 : vector<1x32xf32> to vector<5x32xf32>
      %47 = arith.addf %44, %46 : vector<5x32xf32>
      %c0_35 = arith.constant 0 : index
      %c0_36 = arith.constant 0 : index
      %c0_37 = arith.constant 0 : index
      %48 = vector.load %arg2[%c0_35, %c0_36, %c0_37] : memref<1x5x32xf32, #tpu.memory_space<vmem>>, vector<1x5x32xf32>
      %49 = vector.shape_cast %48 : vector<1x5x32xf32> to vector<5x32xf32>
      %50 = arith.addf %47, %49 : vector<5x32xf32>
      %c0_38 = arith.constant 0 : index
      %c0_39 = arith.constant 0 : index
      %c0_40 = arith.constant 0 : index
      %51 = vector.load %arg10[%c0_38, %c0_39, %c0_40] : memref<1x5x32xf32, #tpu.memory_space<vmem>>, vector<1x5x32xf32>
      %52 = vector.shape_cast %51 : vector<1x5x32xf32> to vector<5x32xf32>
      %53 = vector.shape_cast %50 : vector<5x32xf32> to vector<1x5x32xf32>
      tpu.vector_store %arg10[%c0_38, %c0_39, %c0_40], %53 {strides = array<i32>} : memref<1x5x32xf32, #tpu.memory_space<vmem>>, vector<1x5x32xf32>,
    } else {
    }
    return
  }
  func.func @transform_0(%arg0: i32, %arg1: i32) -> (i32, i32, i32) {
    %c0_i32 = arith.constant 0 : i32
    %c0_i32_0 = arith.constant 0 : i32
    %c0_i32_1 = arith.constant 0 : i32
    return %arg0, %c0_i32, %c0_i32_0 : i32, i32, i32
  }
  func.func @transform_1(%arg0: i32, %arg1: i32) -> (i32, i32) {
    %c0_i32 = arith.constant 0 : i32
    %c0_i32_0 = arith.constant 0 : i32
    %c0_i32_1 = arith.constant 0 : i32
    return %c0_i32, %c0_i32_0 : i32, i32
  }
  func.func @transform_2(%arg0: i32, %arg1: i32) -> (i32, i32) {
    %c0_i32 = arith.constant 0 : i32
    %c0_i32_0 = arith.constant 0 : i32
    %c0_i32_1 = arith.constant 0 : i32
    return %c0_i32, %c0_i32_0 : i32, i32
  }
  func.func @transform_3(%arg0: i32, %arg1: i32) -> (i32, i32, i32) {
    %c0_i32 = arith.constant 0 : i32
    %c0_i32_0 = arith.constant 0 : i32
    %c0_i32_1 = arith.constant 0 : i32
    return %arg1, %c0_i32, %c0_i32_0 : i32, i32, i32
  }
  func.func @transform_4(%arg0: i32, %arg1: i32) -> (i32, i32, i32) {
    %c0_i32 = arith.constant 0 : i32
    %c0_i32_0 = arith.constant 0 : i32
    %c0_i32_1 = arith.constant 0 : i32
    return %arg1, %c0_i32, %c0_i32_0 : i32, i32, i32
  }
  func.func @transform_5(%arg0: i32, %arg1: i32) -> (i32, i32, i32) {
    %c0_i32 = arith.constant 0 : i32
    %c0_i32_0 = arith.constant 0 : i32
    %c0_i32_1 = arith.constant 0 : i32
    return %arg1, %c0_i32, %c0_i32_0 : i32, i32, i32
  }
  func.func @transform_6(%arg0: i32, %arg1: i32) -> (i32, i32, i32) {
    %c0_i32 = arith.constant 0 : i32
    %c0_i32_0 = arith.constant 0 : i32
    %c0_i32_1 = arith.constant 0 : i32
    return %arg1, %c0_i32, %c0_i32_0 : i32, i32, i32
  }
  func.func @transform_7(%arg0: i32, %arg1: i32) -> (i32, i32) {
    %c0_i32 = arith.constant 0 : i32
    %c0_i32_0 = arith.constant 0 : i32
    %c0_i32_1 = arith.constant 0 : i32
    return %c0_i32, %c0_i32_0 : i32, i32
  }
  func.func @transform_8(%arg0: i32, %arg1: i32) -> (i32, i32, i32) {
    %c0_i32 = arith.constant 0 : i32
    %c0_i32_0 = arith.constant 0 : i32
    %c0_i32_1 = arith.constant 0 : i32
    return %arg0, %c0_i32, %c0_i32_0 : i32, i32, i32
  }
  func.func @transform_9(%arg0: i32, %arg1: i32) -> (i32, i32, i32, i32) {
    %c0_i32 = arith.constant 0 : i32
    %c0_i32_0 = arith.constant 0 : i32
    %c0_i32_1 = arith.constant 0 : i32
    return %arg0, %arg1, %c0_i32, %c0_i32_0 : i32, i32, i32, i32
  }
}

module attributes {stable_mosaic.version = 11 : i64} {
  func.func @_ffn_kernel(%arg0: i32, %arg1: memref<16x32xf32, #tpu.memory_space<vmem>>, %arg2: memref<1x32xf32, #tpu.memory_space<vmem>>, %arg3: memref<1x32xf32, #tpu.memory_space<vmem>>, %arg4: memref<32x64xbf16, #tpu.memory_space<vmem>>, %arg5: memref<1x64xf32, #tpu.memory_space<vmem>>, %arg6: memref<64x32xbf16, #tpu.memory_space<vmem>>, %arg7: memref<1x32xf32, #tpu.memory_space<vmem>>, %arg8: memref<16x32xf32, #tpu.memory_space<vmem>>) attributes {dimension_semantics = [#tpu.dimension_semantics<parallel>], iteration_bounds = array<i64: 1>, scalar_prefetch = 0 : i64, scratch_operands = 0 : i64, tpu.core_type = #tpu.core_type<tc>, window_params = [{transform_indices = @transform_0, window_bounds = array<i64: 16, 32>}, {pipeline_mode = #tpu.pipeline_mode<synchronous>, transform_indices = @transform_1, window_bounds = array<i64: 1, 32>}, {pipeline_mode = #tpu.pipeline_mode<synchronous>, transform_indices = @transform_2, window_bounds = array<i64: 1, 32>}, {pipeline_mode = #tpu.pipeline_mode<synchronous>, transform_indices = @transform_3, window_bounds = array<i64: 32, 64>}, {pipeline_mode = #tpu.pipeline_mode<synchronous>, transform_indices = @transform_4, window_bounds = array<i64: 1, 64>}, {pipeline_mode = #tpu.pipeline_mode<synchronous>, transform_indices = @transform_5, window_bounds = array<i64: 64, 32>}, {pipeline_mode = #tpu.pipeline_mode<synchronous>, transform_indices = @transform_6, window_bounds = array<i64: 1, 32>}, {transform_indices = @transform_7, window_bounds = array<i64: 16, 32>}]} {
    %c0 = arith.constant 0 : index
    %c0_0 = arith.constant 0 : index
    %0 = vector.load %arg1[%c0, %c0_0] : memref<16x32xf32, #tpu.memory_space<vmem>>, vector<16x32xf32>
    %c0_1 = arith.constant 0 : index
    %c0_2 = arith.constant 0 : index
    %1 = vector.load %arg2[%c0_1, %c0_2] : memref<1x32xf32, #tpu.memory_space<vmem>>, vector<1x32xf32>
    %c0_3 = arith.constant 0 : index
    %c0_4 = arith.constant 0 : index
    %2 = vector.load %arg3[%c0_3, %c0_4] : memref<1x32xf32, #tpu.memory_space<vmem>>, vector<1x32xf32>
    %cst = arith.constant dense<0.000000e+00> : vector<16xf32>
    %3 = vector.multi_reduction <add>, %0, %cst [1] : vector<16x32xf32> to vector<16xf32>
    %4 = vector.shape_cast %3 : vector<16xf32> to vector<16x1xf32>
    %cst_5 = arith.constant 3.200000e+01 : f32
    %5 = vector.broadcast %cst_5 : f32 to vector<16x1xf32>
    %6 = arith.divf %4, %5 : vector<16x1xf32>
    %7 = vector.broadcast %6 : vector<16x1xf32> to vector<16x32xf32>
    %8 = arith.subf %0, %7 : vector<16x32xf32>
    %9 = arith.mulf %8, %8 : vector<16x32xf32>
    %cst_6 = arith.constant dense<0.000000e+00> : vector<16xf32>
    %10 = vector.multi_reduction <add>, %9, %cst_6 [1] : vector<16x32xf32> to vector<16xf32>
    %11 = vector.shape_cast %10 : vector<16xf32> to vector<16x1xf32>
    %cst_7 = arith.constant 3.200000e+01 : f32
    %12 = vector.broadcast %cst_7 : f32 to vector<16x1xf32>
    %13 = arith.divf %11, %12 : vector<16x1xf32>
    %cst_8 = arith.constant 9.99999974E-6 : f32
    %14 = vector.broadcast %cst_8 : f32 to vector<16x1xf32>
    %15 = arith.addf %13, %14 : vector<16x1xf32>
    %16 = math.rsqrt %15 : vector<16x1xf32>
    %17 = vector.broadcast %16 : vector<16x1xf32> to vector<16x32xf32>
    %18 = arith.mulf %8, %17 : vector<16x32xf32>
    %19 = vector.broadcast %1 : vector<1x32xf32> to vector<16x32xf32>
    %20 = arith.mulf %18, %19 : vector<16x32xf32>
    %21 = vector.broadcast %2 : vector<1x32xf32> to vector<16x32xf32>
    %22 = arith.addf %20, %21 : vector<16x32xf32>
    %23 = arith.truncf %22 : vector<16x32xf32> to vector<16x32xbf16>
    %c0_9 = arith.constant 0 : index
    %c0_10 = arith.constant 0 : index
    %24 = vector.load %arg4[%c0_9, %c0_10] : memref<32x64xbf16, #tpu.memory_space<vmem>>, vector<32x64xbf16>
    %cst_11 = arith.constant dense<0.000000e+00> : vector<16x64xf32>
    %25 = tpu.matmul %23, %24, %cst_11 {dimension_numbers = #tpu.dot_dimension_numbers<[1], [0], [0], [1], [0, 0, 1, 1], [], []>} : vector<16x32xbf16>, vector<32x64xbf16>, vector<16x64xf32> -> vector<16x64xf32>
    %c0_12 = arith.constant 0 : index
    %c0_13 = arith.constant 0 : index
    %26 = vector.load %arg5[%c0_12, %c0_13] : memref<1x64xf32, #tpu.memory_space<vmem>>, vector<1x64xf32>
    %27 = vector.broadcast %26 : vector<1x64xf32> to vector<16x64xf32>
    %28 = arith.addf %25, %27 : vector<16x64xf32>
    %cst_14 = arith.constant 5.000000e-01 : f32
    %29 = vector.broadcast %cst_14 : f32 to vector<16x64xf32>
    %30 = arith.mulf %29, %28 : vector<16x64xf32>
    %cst_15 = arith.constant 0.707106769 : f32
    %31 = vector.broadcast %cst_15 : f32 to vector<16x64xf32>
    %32 = arith.mulf %28, %31 : vector<16x64xf32>
    %33 = math.erf %32 : vector<16x64xf32>
    %cst_16 = arith.constant 1.000000e+00 : f32
    %34 = vector.broadcast %cst_16 : f32 to vector<16x64xf32>
    %35 = arith.addf %34, %33 : vector<16x64xf32>
    %36 = arith.mulf %30, %35 : vector<16x64xf32>
    %37 = arith.truncf %36 : vector<16x64xf32> to vector<16x64xbf16>
    %c0_17 = arith.constant 0 : index
    %c0_18 = arith.constant 0 : index
    %38 = vector.load %arg6[%c0_17, %c0_18] : memref<64x32xbf16, #tpu.memory_space<vmem>>, vector<64x32xbf16>
    %cst_19 = arith.constant dense<0.000000e+00> : vector<16x32xf32>
    %39 = tpu.matmul %37, %38, %cst_19 {dimension_numbers = #tpu.dot_dimension_numbers<[1], [0], [0], [1], [0, 0, 1, 1], [], []>} : vector<16x64xbf16>, vector<64x32xbf16>, vector<16x32xf32> -> vector<16x32xf32>
    %c0_20 = arith.constant 0 : index
    %c0_21 = arith.constant 0 : index
    %40 = vector.load %arg7[%c0_20, %c0_21] : memref<1x32xf32, #tpu.memory_space<vmem>>, vector<1x32xf32>
    %41 = vector.broadcast %40 : vector<1x32xf32> to vector<16x32xf32>
    %42 = arith.addf %39, %41 : vector<16x32xf32>
    %43 = arith.addf %42, %0 : vector<16x32xf32>
    %c0_22 = arith.constant 0 : index
    %c0_23 = arith.constant 0 : index
    %44 = vector.load %arg8[%c0_22, %c0_23] : memref<16x32xf32, #tpu.memory_space<vmem>>, vector<16x32xf32>
    tpu.vector_store %arg8[%c0_22, %c0_23], %43 {strides = array<i32>} : memref<16x32xf32, #tpu.memory_space<vmem>>, vector<16x32xf32>,
    return
  }
  func.func @transform_0(%arg0: i32) -> (i32, i32) {
    %c0_i32 = arith.constant 0 : i32
    %c0_i32_0 = arith.constant 0 : i32
    return %arg0, %c0_i32 : i32, i32
  }
  func.func @transform_1(%arg0: i32) -> (i32, i32) {
    %c0_i32 = arith.constant 0 : i32
    %c0_i32_0 = arith.constant 0 : i32
    %c0_i32_1 = arith.constant 0 : i32
    return %c0_i32, %c0_i32_0 : i32, i32
  }
  func.func @transform_2(%arg0: i32) -> (i32, i32) {
    %c0_i32 = arith.constant 0 : i32
    %c0_i32_0 = arith.constant 0 : i32
    %c0_i32_1 = arith.constant 0 : i32
    return %c0_i32, %c0_i32_0 : i32, i32
  }
  func.func @transform_3(%arg0: i32) -> (i32, i32) {
    %c0_i32 = arith.constant 0 : i32
    %c0_i32_0 = arith.constant 0 : i32
    %c0_i32_1 = arith.constant 0 : i32
    return %c0_i32, %c0_i32_0 : i32, i32
  }
  func.func @transform_4(%arg0: i32) -> (i32, i32) {
    %c0_i32 = arith.constant 0 : i32
    %c0_i32_0 = arith.constant 0 : i32
    %c0_i32_1 = arith.constant 0 : i32
    return %c0_i32, %c0_i32_0 : i32, i32
  }
  func.func @transform_5(%arg0: i32) -> (i32, i32) {
    %c0_i32 = arith.constant 0 : i32
    %c0_i32_0 = arith.constant 0 : i32
    %c0_i32_1 = arith.constant 0 : i32
    return %c0_i32, %c0_i32_0 : i32, i32
  }
  func.func @transform_6(%arg0: i32) -> (i32, i32) {
    %c0_i32 = arith.constant 0 : i32
    %c0_i32_0 = arith.constant 0 : i32
    %c0_i32_1 = arith.constant 0 : i32
    return %c0_i32, %c0_i32_0 : i32, i32
  }
  func.func @transform_7(%arg0: i32) -> (i32, i32) {
    %c0_i32 = arith.constant 0 : i32
    %c0_i32_0 = arith.constant 0 : i32
    return %arg0, %c0_i32 : i32, i32
  }
}

module attributes {stable_mosaic.version = 11 : i64} {
  func.func @_ln_dense_kernel(%arg0: i32, %arg1: memref<8x32xf32, #tpu.memory_space<vmem>>, %arg2: memref<1x32xf32, #tpu.memory_space<vmem>>, %arg3: memref<1x32xf32, #tpu.memory_space<vmem>>, %arg4: memref<32x10xbf16, #tpu.memory_space<vmem>>, %arg5: memref<1x10xf32, #tpu.memory_space<vmem>>, %arg6: memref<8x10xf32, #tpu.memory_space<vmem>>) attributes {dimension_semantics = [#tpu.dimension_semantics<parallel>], iteration_bounds = array<i64: 1>, scalar_prefetch = 0 : i64, scratch_operands = 0 : i64, tpu.core_type = #tpu.core_type<tc>, window_params = [{transform_indices = @transform_0, window_bounds = array<i64: 8, 32>}, {pipeline_mode = #tpu.pipeline_mode<synchronous>, transform_indices = @transform_1, window_bounds = array<i64: 1, 32>}, {pipeline_mode = #tpu.pipeline_mode<synchronous>, transform_indices = @transform_2, window_bounds = array<i64: 1, 32>}, {pipeline_mode = #tpu.pipeline_mode<synchronous>, transform_indices = @transform_3, window_bounds = array<i64: 32, 10>}, {pipeline_mode = #tpu.pipeline_mode<synchronous>, transform_indices = @transform_4, window_bounds = array<i64: 1, 10>}, {transform_indices = @transform_5, window_bounds = array<i64: 8, 10>}]} {
    %c0 = arith.constant 0 : index
    %c0_0 = arith.constant 0 : index
    %0 = vector.load %arg1[%c0, %c0_0] : memref<8x32xf32, #tpu.memory_space<vmem>>, vector<8x32xf32>
    %c0_1 = arith.constant 0 : index
    %c0_2 = arith.constant 0 : index
    %1 = vector.load %arg2[%c0_1, %c0_2] : memref<1x32xf32, #tpu.memory_space<vmem>>, vector<1x32xf32>
    %c0_3 = arith.constant 0 : index
    %c0_4 = arith.constant 0 : index
    %2 = vector.load %arg3[%c0_3, %c0_4] : memref<1x32xf32, #tpu.memory_space<vmem>>, vector<1x32xf32>
    %cst = arith.constant dense<0.000000e+00> : vector<8xf32>
    %3 = vector.multi_reduction <add>, %0, %cst [1] : vector<8x32xf32> to vector<8xf32>
    %4 = vector.shape_cast %3 : vector<8xf32> to vector<8x1xf32>
    %cst_5 = arith.constant 3.200000e+01 : f32
    %5 = vector.broadcast %cst_5 : f32 to vector<8x1xf32>
    %6 = arith.divf %4, %5 : vector<8x1xf32>
    %7 = vector.broadcast %6 : vector<8x1xf32> to vector<8x32xf32>
    %8 = arith.subf %0, %7 : vector<8x32xf32>
    %9 = arith.mulf %8, %8 : vector<8x32xf32>
    %cst_6 = arith.constant dense<0.000000e+00> : vector<8xf32>
    %10 = vector.multi_reduction <add>, %9, %cst_6 [1] : vector<8x32xf32> to vector<8xf32>
    %11 = vector.shape_cast %10 : vector<8xf32> to vector<8x1xf32>
    %cst_7 = arith.constant 3.200000e+01 : f32
    %12 = vector.broadcast %cst_7 : f32 to vector<8x1xf32>
    %13 = arith.divf %11, %12 : vector<8x1xf32>
    %cst_8 = arith.constant 9.99999974E-6 : f32
    %14 = vector.broadcast %cst_8 : f32 to vector<8x1xf32>
    %15 = arith.addf %13, %14 : vector<8x1xf32>
    %16 = math.rsqrt %15 : vector<8x1xf32>
    %17 = vector.broadcast %16 : vector<8x1xf32> to vector<8x32xf32>
    %18 = arith.mulf %8, %17 : vector<8x32xf32>
    %19 = vector.broadcast %1 : vector<1x32xf32> to vector<8x32xf32>
    %20 = arith.mulf %18, %19 : vector<8x32xf32>
    %21 = vector.broadcast %2 : vector<1x32xf32> to vector<8x32xf32>
    %22 = arith.addf %20, %21 : vector<8x32xf32>
    %23 = arith.truncf %22 : vector<8x32xf32> to vector<8x32xbf16>
    %c0_9 = arith.constant 0 : index
    %c0_10 = arith.constant 0 : index
    %24 = vector.load %arg4[%c0_9, %c0_10] : memref<32x10xbf16, #tpu.memory_space<vmem>>, vector<32x10xbf16>
    %cst_11 = arith.constant dense<0.000000e+00> : vector<8x10xf32>
    %25 = tpu.matmul %23, %24, %cst_11 {dimension_numbers = #tpu.dot_dimension_numbers<[1], [0], [0], [1], [0, 0, 1, 1], [], []>} : vector<8x32xbf16>, vector<32x10xbf16>, vector<8x10xf32> -> vector<8x10xf32>
    %c0_12 = arith.constant 0 : index
    %c0_13 = arith.constant 0 : index
    %26 = vector.load %arg5[%c0_12, %c0_13] : memref<1x10xf32, #tpu.memory_space<vmem>>, vector<1x10xf32>
    %27 = vector.broadcast %26 : vector<1x10xf32> to vector<8x10xf32>
    %28 = arith.addf %25, %27 : vector<8x10xf32>
    %c0_14 = arith.constant 0 : index
    %c0_15 = arith.constant 0 : index
    %29 = vector.load %arg6[%c0_14, %c0_15] : memref<8x10xf32, #tpu.memory_space<vmem>>, vector<8x10xf32>
    tpu.vector_store %arg6[%c0_14, %c0_15], %28 {strides = array<i32>} : memref<8x10xf32, #tpu.memory_space<vmem>>, vector<8x10xf32>,
    return
  }
  func.func @transform_0(%arg0: i32) -> (i32, i32) {
    %c0_i32 = arith.constant 0 : i32
    %c0_i32_0 = arith.constant 0 : i32
    return %arg0, %c0_i32 : i32, i32
  }
  func.func @transform_1(%arg0: i32) -> (i32, i32) {
    %c0_i32 = arith.constant 0 : i32
    %c0_i32_0 = arith.constant 0 : i32
    %c0_i32_1 = arith.constant 0 : i32
    return %c0_i32, %c0_i32_0 : i32, i32
  }
  func.func @transform_2(%arg0: i32) -> (i32, i32) {
    %c0_i32 = arith.constant 0 : i32
    %c0_i32_0 = arith.constant 0 : i32
    %c0_i32_1 = arith.constant 0 : i32
    return %c0_i32, %c0_i32_0 : i32, i32
  }
  func.func @transform_3(%arg0: i32) -> (i32, i32) {
    %c0_i32 = arith.constant 0 : i32
    %c0_i32_0 = arith.constant 0 : i32
    %c0_i32_1 = arith.constant 0 : i32
    return %c0_i32, %c0_i32_0 : i32, i32
  }
  func.func @transform_4(%arg0: i32) -> (i32, i32) {
    %c0_i32 = arith.constant 0 : i32
    %c0_i32_0 = arith.constant 0 : i32
    %c0_i32_1 = arith.constant 0 : i32
    return %c0_i32, %c0_i32_0 : i32, i32
  }
  func.func @transform_5(%arg0: i32) -> (i32, i32) {
    %c0_i32 = arith.constant 0 : i32
    %c0_i32_0 = arith.constant 0 : i32
    return %arg0, %c0_i32 : i32, i32
  }
}

</mosaic_0001>

<bundles_post_ra>
// kernel: vit_forward.6
= control target key start
LH: loop header
LB: loop body
LE: loop exit
PB: predicated region body
PF: predicated region fallthrough
CT: control target
= control target key end

     0   :  { %vm119_vm0 = vcmask 523264   ;;  %vm149_vm1 = vcmask 261120   ;;  %s285_s1 = inlined_call_operand.vmem [shape: bf16[192,32], index: 1, kind: input, shape index: {}]   ;;  %s286_s0 = inlined_call_operand.vmem [shape: f32[8,192], index: 0, kind: input, shape index: {}]   ;;  %s287_s2 = inlined_call_operand.vmem [shape: f32[1,32], index: 2, kind: input, shape index: {}]   ;;  %s288_s3 = inlined_call_operand.vmem [shape: f32[8,32], index: 3, kind: output, shape index: {}]  }
   0x1   :  { %v211_v0 = vld [vmem:[%s285_s1 + $0x38] sm:$0xff]  ;;  %v210_v2 = vld [vmem:[%s285_s1 + $0x30] sm:$0xff]  ;;  %v209_v4 = vld [vmem:[%s285_s1 + $0x28] sm:$0xff] }
   0x2   :  { %v215_v1 = vld [vmem:[%s285_s1 + $0x58] sm:$0xff]  ;;  %123 = vmatpush.bf16.msra.mxu0 %v211_v0  ;;  %v214_v3 = vld [vmem:[%s285_s1 + $0x50] sm:$0xff]  ;;  %v213_v5 = vld [vmem:[%s285_s1 + $0x48] sm:$0xff] }
   0x3   :  { %140 = vmatpush.bf16.msra.mxu1 %v215_v1  ;;  %v208_v6 = vld [vmem:[%s285_s1 + $0x20] sm:$0xff]  ;;  %v16_v8 = vld [vmem:[%s286_s0 + $0x8] sm:$0xff]  ;;  %v207_v9 = vld [vmem:[%s285_s1 + $0x18] sm:$0xff] }
   0x4   :  { %v212_v7 = vld [vmem:[%s285_s1 + $0x40] sm:$0xff]  ;;  %v18_v10 = vpack.c.bf16 %v16_v8, %v16_v8  ;;  %v206_v11 = vld [vmem:[%s285_s1 + $0x10] sm:$0xff]  ;;  %v205_v12 = vld [vmem:[%s285_s1 + $0x8] sm:$0xff] }
   0x5   :  { %v204_v13 = vld [vmem:[%s285_s1] sm:$0xff] }
   0x6   :  { %124 = vmatpush.bf16.msra.mxu0 %v210_v2  ;;  %v15_v14 = vld [vmem:[%s286_s0] sm:$0xff] }
   0x7   :  { %141 = vmatpush.bf16.msra.mxu1 %v214_v3  ;;  %v17_v15 = vpack.c.bf16 %v15_v14, %v15_v14  ;;  %v216_v18 = vld [vmem:[%s287_s2] ss:$0 sm:$0xff] }
   0xa   :  { %125 = vmatpush.bf16.msra.mxu0 %v209_v4 }
   0xb   :  { %142 = vmatpush.bf16.msra.mxu1 %v213_v5 }
   0xe   :  { %126 = vmatpush.bf16.msra.mxu0 %v208_v6 }
   0xf   :  { %143 = vmatpush.bf16.msra.mxu1 %v212_v7 }
  0x12   :  { %127 = vmatpush.bf16.msra.mxu0 %v207_v9  ;;  %203 = vmatmul.msk.bf16.vlgmr.msra.gmra.mxu1 %vm119_vm0, %v18_v10 }
  0x16   :  { %128 = vmatpush.bf16.msra.mxu0 %v206_v11 }
  0x1a   :  { %129 = vmatpush.bf16.msra.mxu0 %v205_v12 }
  0x1e   :  { %130 = vmatpush.bf16.msra.mxu0 %v204_v13 }
  0x21   :  { %131 = vmatmul.bf16.vlgmr.msra.gmra.mxu0 %v17_v15 }
  0x8f   :  { %v145_v16 = vpop.f32.mrf.mxu1 }
  0x97   :  { %v147_v17 = vpop.f32.mrf.mxu1 }
  0x9e   :  { %v132_v19 = vpop.f32.mrf.mxu0 }
  0x9f   :  { %v133_v20 = vadd.f32 %v216_v18, %v132_v19 }
  0xa1   :  { %v146_v21 = vadd.f32 %v145_v16, %v133_v20 }
  0xa3   :  { %150 = vst.msk [vmem:[%s288_s3] sm:$0xff] %vm149_vm1, %v146_v21 }
  0xa6   :  { %v134_v22 = vpop.f32.mrf.mxu0 }

// kernel: vit_forward.8
= control target key start
LH: loop header
LB: loop body
LE: loop exit
PB: predicated region body
PF: predicated region fallthrough
CT: control target
= control target key end

     0   :  { %vm31_vm0 = vcmask 261120   ;;  %v331_v4 = vmov 32.0   ;;  %s449_s0 = inlined_call_operand.vmem [shape: f32[16,32], index: 0, kind: input, shape index: {}]   ;;  %s450_s1 = inlined_call_operand.vmem [shape: f32[1,32], index: 1, kind: input, shape index: {}]   ;;  %s451_s2 = inlined_call_operand.vmem [shape: f32[1,32], index: 2, kind: input, shape index: {}]   ;;  %s452_s4 = inlined_call_operand.vmem [shape: f32[1,64], index: 4, kind: input, shape index: {}]   ;;  %s453_s3 = inlined_call_operand.vmem [shape: bf16[32,64], index: 3, kind: input, shape index: {}]   ;;  %s454_s6 = inlined_call_operand.vmem [shape: f32[1,32], index: 6, kind: input, shape index: {}]   ;;  %s455_s5 = inlined_call_operand.vmem [shape: bf16[64,32], index: 5, kind: input, shape index: {}]   ;;  %s456_s7 = inlined_call_operand.vmem [shape: f32[16,32], index: 7, kind: output, shape index: {}]  }
   0x1   :  { %v375_v0 = vld [vmem:[%s449_s0] sm:$0xff]  ;;  %v382_v2 = vld [vmem:[%s449_s0 + $0x8] sm:$0xff]  ;;  %321 = vrcp.f32 %v331_v4 }
   0x2   :  { %v32_v1 = vsel %vm31_vm0, %v375_v0, 0.0  ;;  %v35_v3 = vsel %vm31_vm0, %v382_v2, 0.0  ;;  %v311_v21 = vld [vmem:[%s453_s3 + $0x8] sm:$0xff]  ;;  %v310_v23 = vld [vmem:[%s453_s3] sm:$0xff] }
   0x3   :  { %33 = vadd.xlane.f32.xlu0 %v32_v1  ;;  %123 = vmatpush.bf16.msra.mxu0 %v311_v21  ;;  %v317_v42 = vld [vmem:[%s450_s1] ss:$0 sm:$0xff] }
   0x4   :  { %v318_v47 = vld [vmem:[%s451_s2] ss:$0 sm:$0xff] }
   0x5   :  { %v319_v52 = vld [vmem:[%s452_s4] ss:$0 sm:$0xff] }
   0x7   :  { %v322_v5 = vpop.eup %321  ;;  %124 = vmatpush.bf16.msra.mxu0 %v310_v23 }
   0x8   :  { %v39_v6 = vmul.f32 32.0, %v322_v5  ;;  %vm43_vm1 = vweird.f32 %v322_v5 }
   0xa   :  { %v40_v7 = vsub.f32 1.0, %v39_v6 }
   0xb   :  { %36 = vadd.xlane.f32.xlu0 %v35_v3 }
   0xc   :  { %v41_v8 = vmul.f32 %v322_v5, %v40_v7 }
   0xe   :  { %v42_v9 = vadd.f32 %v322_v5, %v41_v8 }
  0x10   :  { %v44_v10 = vsel %vm43_vm1, %v322_v5, %v42_v9  ;;  %v315_v9 = vld [vmem:[%s455_s5 + $0x18] sm:$0xff]  ;;  %vm256_vm1 = vcmask 523264  }
  0x11   :  { %264 = vmatpush.bf16.msra.mxu1 %v315_v9 }
  0x76   :  { %v34_v11 = vpop.xlane.xlu0 %33 }
  0x77   :  { %v45_v12 = vmul.f32 %v44_v10, %v34_v11 }
  0x79   :  { %v47_v13 = vsub.f32 %v375_v0, %v45_v12 }
  0x7b   :  { %v49_v14 = vmul.f32 %v47_v13, %v47_v13 }
  0x7d   :  { %v51_v15 = vsel %vm31_vm0, %v49_v14, 0.0 }
  0x7e   :  { %52 = vadd.xlane.f32.xlu1 %v51_v15  ;;  %v37_v16 = vpop.xlane.xlu0 %36 }
  0x7f   :  { %v46_v17 = vmul.f32 %v44_v10, %v37_v16 }
  0x81   :  { %v48_v18 = vsub.f32 %v382_v2, %v46_v17  ;;  %v314_v17 = vld [vmem:[%s455_s5 + $0x10] sm:$0xff] }
  0x82   :  { %265 = vmatpush.bf16.msra.mxu1 %v314_v17 }
  0x83   :  { %v50_v19 = vmul.f32 %v48_v18, %v48_v18 }
  0x85   :  { %v54_v20 = vsel %vm31_vm0, %v50_v19, 0.0 }
  0x86   :  { %55 = vadd.xlane.f32.xlu1 %v54_v20 }
  0xf1   :  { %v53_v22 = vpop.xlane.xlu1 %52 }
  0xf2   :  { %v57_v24 = vmul.f32 %v53_v22, %v44_v10 }
  0xf4   :  { %v59_v25 = vadd.f32 1e-05, %v57_v24 }
  0xf6   :  { %323 = vrsqrt.f32 %v59_v25  ;;  %vm67_vm3 = vweird.f32 %v59_v25 }
  0xf9   :  { %v56_v26 = vpop.xlane.xlu1 %55 }
  0xfa   :  { %v58_v27 = vmul.f32 %v56_v26, %v44_v10 }
  0xfc   :  { %v324_v28 = vpop.eup %323  ;;  %v60_v29 = vadd.f32 1e-05, %v58_v27 }
  0xfd   :  { %v62_v30 = vmul.f32 %v324_v28, %v59_v25  ;;  %vm68_vm2 = vweird.f32 %v324_v28  ;;  %v313_v25 = vld [vmem:[%s455_s5 + $0x8] sm:$0xff] }
  0xfe   :  { %325 = vrsqrt.f32 %v60_v29  ;;  %vm69_vm4 = vmor %vm67_vm3, %vm68_vm2  ;;  %vm77_vm6 = vweird.f32 %v60_v29  ;;  %266 = vmatpush.bf16.msra.mxu1 %v313_v25 }
  0xff   :  { %v63_v31 = vmul.f32 %v324_v28, %v62_v30 }
 0x101   :  { %v64_v32 = vmul.f32 0.5, %v63_v31  ;;  %v312_v31 = vld [vmem:[%s455_s5] sm:$0xff] }
 0x102   :  { %267 = vmatpush.bf16.msra.mxu1 %v312_v31 }
 0x103   :  { %v65_v33 = vsub.f32 1.5, %v64_v32 }
 0x104   :  { %v326_v34 = vpop.eup %325 }
 0x105   :  { %v66_v35 = vmul.f32 %v324_v28, %v65_v33  ;;  %v72_v36 = vmul.f32 %v326_v34, %v60_v29  ;;  %vm78_vm5 = vweird.f32 %v326_v34 }
 0x106   :  { %vm79_vm7 = vmor %vm77_vm6, %vm78_vm5 }
 0x107   :  { %v73_v37 = vmul.f32 %v326_v34, %v72_v36  ;;  %v70_v38 = vsel %vm69_vm4, %v324_v28, %v66_v35 }
 0x108   :  { %v81_v41 = vmul.f32 %v70_v38, %v47_v13 }
 0x109   :  { %v74_v39 = vmul.f32 0.5, %v73_v37 }
 0x10a   :  { %v86_v46 = vmul.f32 %v317_v42, %v81_v41 }
 0x10b   :  { %v75_v40 = vsub.f32 1.5, %v74_v39 }
 0x10c   :  { %v91_v49 = vadd.f32 %v318_v47, %v86_v46 }
 0x10d   :  { %v76_v43 = vmul.f32 %v326_v34, %v75_v40 }
 0x10f   :  { %v80_v44 = vsel %vm79_vm7, %v326_v34, %v76_v43 }
 0x110   :  { %v82_v45 = vmul.f32 %v80_v44, %v48_v18 }
 0x112   :  { %v87_v48 = vmul.f32 %v317_v42, %v82_v45 }
 0x114   :  { %v92_v50 = vadd.f32 %v318_v47, %v87_v48 }
 0x116   :  { %v93_v51 = vpack.c.bf16 %v92_v50, %v91_v49 }
 0x118   :  { %290 = vmatmul.msk.bf16.vlgmr.msra.gmra.mxu0 %vm31_vm0, %v93_v51 }
 0x195   :  { %v126_v53 = vpop.f32.mrf.mxu0 }
 0x196   :  { %v406_v54 = vadd.f32 %v319_v52, %v126_v53 }
 0x198   :  { %v409_v55 = vmul.f32 0.70710677, %v406_v54 }
 0x19a   :  { %v135_v56 = vmul.f32 %v409_v55, %v409_v55 }
 0x19c   :  { %v136_v57 = vmin.f32 %v135_v56, 16.0 }
 0x19d   :  { %v128_v58 = vpop.f32.mrf.mxu0 }
 0x19e   :  { %v137_v59 = vmul.f32 2.1237322e-06, %v136_v57  ;;  %v148_v60 = vmul.f32 3.8918573e-05, %v136_v57  ;;  %v413_v61 = vadd.f32 %v319_v52, %v128_v58 }
 0x1a0   :  { %v138_v62 = vadd.f32 0.00028619796, %v137_v59  ;;  %v149_v63 = vadd.f32 0.001143296, %v148_v60  ;;  %v416_v1 = vmul.f32 0.70710677, %v413_v61 }
 0x1a2   :  { %v150_v3 = vmul.f32 %v149_v63, %v136_v57  ;;  %v175_v4 = vmul.f32 %v416_v1, %v416_v1  ;;  %v139_v5 = vmul.f32 %v138_v62, %v136_v57 }
 0x1a4   :  { %v151_v6 = vadd.f32 0.014752088, %v150_v3  ;;  %v176_v7 = vmin.f32 %v175_v4, 16.0  ;;  %v140_v12 = vadd.f32 0.0036580483, %v139_v5 }
 0x1a6   :  { %v152_v8 = vmul.f32 %v151_v6, %v136_v57  ;;  %v177_v10 = vmul.f32 2.1237322e-06, %v176_v7  ;;  %v188_v11 = vmul.f32 3.8918573e-05, %v176_v7  ;;  %v141_v20 = vmul.f32 %v140_v12, %v136_v57 }
 0x1a8   :  { %v153_v13 = vadd.f32 0.112945676, %v152_v8  ;;  %v178_v14 = vadd.f32 0.00028619796, %v177_v10  ;;  %v189_v15 = vadd.f32 0.001143296, %v188_v11 }
 0x1a9   :  { %v142_v27 = vadd.f32 0.05243302, %v141_v20 }
 0x1aa   :  { %v154_v16 = vmul.f32 %v153_v13, %v136_v57  ;;  %v179_v18 = vmul.f32 %v178_v14, %v176_v7  ;;  %v190_v19 = vmul.f32 %v189_v15, %v176_v7  ;;  %v131_v13 = vmul.f32 0.5, %v406_v54 }
 0x1ab   :  { %v143_v33 = vmul.f32 %v142_v27, %v136_v57  ;;  %v132_v14 = vmul.f32 0.5, %v413_v61 }
 0x1ac   :  { %v155_v21 = vadd.f32 0.4994258, %v154_v16  ;;  %v180_v22 = vadd.f32 0.0036580483, %v179_v18  ;;  %v191_v23 = vadd.f32 0.014752088, %v190_v19 }
 0x1ad   :  { %v144_v38 = vadd.f32 0.18741608, %v143_v33 }
 0x1ae   :  { %v156_v24 = vmul.f32 %v155_v21, %v136_v57  ;;  %v192_v26 = vmul.f32 %v191_v23, %v176_v7  ;;  %v181_v29 = vmul.f32 %v180_v22, %v176_v7 }
 0x1af   :  { %v145_v43 = vmul.f32 %v144_v38, %v136_v57 }
 0x1b0   :  { %v157_v28 = vadd.f32 1.0, %v156_v24  ;;  %v193_v30 = vadd.f32 0.112945676, %v192_v26  ;;  %v182_v34 = vadd.f32 0.05243302, %v181_v29 }
 0x1b1   :  { %v146_v49 = vadd.f32 1.1283791, %v145_v43 }
 0x1b2   :  { %327 = vrcp.f32 %v157_v28  ;;  %v194_v32 = vmul.f32 %v193_v30, %v176_v7  ;;  %v183_v40 = vmul.f32 %v182_v34, %v176_v7  ;;  %v169_v45 = vand.u32 2147483648, %v157_v28 }
 0x1b3   :  { %v167_v47 = vand.u32 2147483647, %v157_v28  ;;  %vm163_vm9 = vweird.f32 %v157_v28  ;;  %v147_v59 = vmul.f32 %v146_v49, %v409_v55 }
 0x1b4   :  { %v195_v35 = vadd.f32 0.4994258, %v194_v32  ;;  %v184_v46 = vadd.f32 0.18741608, %v183_v40  ;;  %v170_v52 = vor.u32 1.1754944e-38, %v169_v45 }
 0x1b5   :  { %vm168_vm11 = vcmp.eq.f32.partialorder %v167_v47, 8.507059e+37 }
 0x1b6   :  { %v196_v36 = vmul.f32 %v195_v35, %v176_v7  ;;  %v185_v53 = vmul.f32 %v184_v46, %v176_v7 }
 0x1b8   :  { %v328_v37 = vpop.eup %327  ;;  %v197_v41 = vadd.f32 1.0, %v196_v36  ;;  %v186_v57 = vadd.f32 1.1283791, %v185_v53 }
 0x1b9   :  { %v159_v39 = vmul.f32 %v328_v37, %v157_v28  ;;  %vm164_vm8 = vweird.f32 %v328_v37 }
 0x1ba   :  { %329 = vrcp.f32 %v197_v41  ;;  %vm165_vm10 = vmor %vm163_vm9, %vm164_vm8  ;;  %v209_v62 = vand.u32 2147483648, %v197_v41  ;;  %v207_v4 = vand.u32 2147483647, %v197_v41  ;;  %vm203_vm13 = vweird.f32 %v197_v41 }
 0x1bb   :  { %v160_v42 = vsub.f32 1.0, %v159_v39  ;;  %v187_v9 = vmul.f32 %v186_v57, %v416_v1  ;;  %v320_v1 = vld [vmem:[%s454_s6] ss:$0 sm:$0xff] }
 0x1bc   :  { %v210_v6 = vor.u32 1.1754944e-38, %v209_v62  ;;  %vm208_vm15 = vcmp.eq.f32.partialorder %v207_v4, 8.507059e+37 }
 0x1bd   :  { %v161_v44 = vmul.f32 %v328_v37, %v160_v42 }
 0x1bf   :  { %v162_v48 = vadd.f32 %v328_v37, %v161_v44 }
 0x1c0   :  { %v330_v50 = vpop.eup %329 }
 0x1c1   :  { %v166_v51 = vsel %vm165_vm10, %v328_v37, %v162_v48  ;;  %v199_v56 = vmul.f32 %v330_v50, %v197_v41  ;;  %vm204_vm12 = vweird.f32 %v330_v50 }
 0x1c2   :  { %v171_v58 = vsel %vm168_vm11, %v170_v52, %v166_v51  ;;  %vm205_vm14 = vmor %vm203_vm13, %vm204_vm12 }
 0x1c3   :  { %v200_v60 = vsub.f32 1.0, %v199_v56  ;;  %v172_v63 = vmul.f32 %v171_v58, %v147_v59 }
 0x1c5   :  { %v201_v3 = vmul.f32 %v330_v50, %v200_v60  ;;  %v291_v8 = vclamps-f32 %v172_v63, 1.0 }
 0x1c7   :  { %v202_v5 = vadd.f32 %v330_v50, %v201_v3  ;;  %v215_v12 = vadd.f32 1.0, %v291_v8 }
 0x1c9   :  { %v206_v7 = vsel %vm205_vm14, %v330_v50, %v202_v5  ;;  %v217_v16 = vmul.f32 %v215_v12, %v131_v13 }
 0x1ca   :  { %v211_v10 = vsel %vm208_vm15, %v210_v6, %v206_v7 }
 0x1cb   :  { %v212_v11 = vmul.f32 %v211_v10, %v187_v9 }
 0x1cd   :  { %v292_v55 = vclamps-f32 %v212_v11, 1.0 }
 0x1cf   :  { %v216_v15 = vadd.f32 1.0, %v292_v55 }
 0x1d1   :  { %v218_v17 = vmul.f32 %v216_v15, %v132_v14 }
 0x1d3   :  { %v219_v18 = vpack.c.bf16 %v218_v17, %v217_v16 }
 0x1d5   :  { %309 = vmatmul.msk.bf16.vlgmr.msra.gmra.mxu1 %vm256_vm1, %v219_v18 }
 0x252   :  { %v269_v19 = vpop.f32.mrf.mxu1 }
 0x253   :  { %v270_v20 = vadd.f32 %v320_v1, %v269_v19 }
 0x255   :  { %v274_v21 = vadd.f32 %v270_v20, %v375_v0 }
 0x257   :  { %276 = vst.msk [vmem:[%s456_s7] sm:$0xff] %vm31_vm0, %v274_v21 }
 0x25a   :  { %v271_v54 = vpop.f32.mrf.mxu1 }
 0x25b   :  { %v272_v61 = vadd.f32 %v320_v1, %v271_v54 }
 0x25d   :  { %v275_v22 = vadd.f32 %v272_v61, %v382_v2 }
 0x25f   :  { %277 = vst.msk [vmem:[%s456_s7 + $0x8] sm:$0xff] %vm31_vm0, %v275_v22 }

// kernel: vit_forward.7
= control target key start
LH: loop header
LB: loop body
LE: loop exit
PB: predicated region body
PF: predicated region fallthrough
CT: control target
= control target key end

     0   :  { %s1064_s30 = smov 0   ;;  %s1066_s10 = smov 0   ;;  %s1181_s0 = inlined_call_operand.vmem [shape: f32[2,5,32], index: 0, kind: input, shape index: {}]   ;;  %s1182_s1 = inlined_call_operand.vmem [shape: f32[1,32], index: 1, kind: input, shape index: {}]   ;;  %s1183_s2 = inlined_call_operand.vmem [shape: f32[1,32], index: 2, kind: input, shape index: {}]   ;;  %s1184_s3 = inlined_call_operand.vmem [shape: bf16[4,32,16], index: 3, kind: input, shape index: {}]   ;;  %s1185_s4 = inlined_call_operand.vmem [shape: bf16[4,32,16], index: 4, kind: input, shape index: {}]   ;;  %s1186_s5 = inlined_call_operand.vmem [shape: bf16[4,32,16], index: 5, kind: input, shape index: {}]   ;;  %s1187_s6 = inlined_call_operand.vmem [shape: bf16[4,16,32], index: 6, kind: input, shape index: {}]   ;;  %s1188_s7 = inlined_call_operand.vmem [shape: f32[1,32], index: 7, kind: input, shape index: {}]   ;;  %s1189_s8 = inlined_call_operand.vmem [shape: f32[2,5,32], index: 8, kind: output, shape index: {0}]   ;;  %s1190_s9 = inlined_call_operand.vmem [shape: f32[2,4,5,16], index: 9, kind: output, shape index: {1}]  }
   0x1   :  { %1193 = sst [smem:[#allocation8_spill]] %s1181_s0  ;;  %s1068_s11 = smov 0  }
   0x2   :  { %1194 = sst [smem:[#allocation9_spill]] %s1184_s3  ;;  %s1070_s12 = smov 0  }
   0x3   :  { %1195 = sst [smem:[#allocation10_spill]] %s1185_s4  ;;  %s1072_s13 = smov 0  }
   0x4 LB: > { %1196 = sst [smem:[#allocation4_spill]] %s1001_s11  ;;  %s29_s14 = sadd.s32 1, %s1001_s11  ;;  %s1009_s13 = sphi %s1072_s13, %s20_s13   ;;  %s1005_s12 = sphi %s1070_s12, %s1206_s12   ;;  %s1001_s11 = sphi %s1068_s11, %s1205_s11   ;;  %s997_s10 = sphi %s1066_s10, %s1204_s10   ;;  %s993_s30 = sphi %s1064_s30, %s1203_s30  }
   0x5   : > { %1197 = sst [smem:[#allocation5_spill]] %s1005_s12  ;;  %s32_s15 = sadd.s32 1, %s1005_s12 }
   0x6   : > { %p30_p0 = scmp.ge.s32.totalorder %s29_s14, 4  ;;  %p855_p1 = scmp.ge.s32.totalorder %s1009_s13, 1 }
   0x7   : > { %p343_p2 = scmp.lt.s32.totalorder %s1009_s13, 9 }
   0x8   : > { %s1208_s14 = smov (%p30_p0, %s29_s14), 0  ;;  %s1210_s15 = smov (!%p30_p0, %s32_s15), %s1005_s12 }
   0x9   : > { %1198 = sst [smem:[#allocation6_spill]] %s1208_s14  ;;  %p344_p3 = pnand %p855_p1, %p343_p2 }
   0xa   : > { %p34_p4 = scmp.ge.s32.totalorder %s1210_s15, 2  ;;  %p405_p5 = scmp.lt.s32.totalorder (!%p344_p3), %s997_s10, 1 }
   0xb   : > { %347 = sbr.rel (%p344_p3) target bundleno = 1103 (0x44f), region = 52  ;;  %p409_p6 = scmp.lt.s32.totalorder (!%p344_p3), %s993_s30, 3 }
   0xc   : > { %s1212_s15 = smov (%p34_p4, %s1210_s15), 0  ;;  %s1200_s0 = sld [smem:[#allocation8_spill]] (!%p344_p3) }
   0xd   : > { %1199 = sst [smem:[#allocation7_spill]] %s1212_s15  ;;  %p868_p7 = scmp.ne.s32.totalorder (!%p344_p3), %s993_s30, 0 }
   0xe   : > { %s1201_s3 = sld [smem:[#allocation9_spill]] (!%p344_p3) }
   0xf   : > { %s1202_s4 = sld [smem:[#allocation10_spill]] (!%p344_p3) }
  0x10   : > { %s1214_s10 = smov (!%p405_p5, %s997_s10), 1 }
  0x11   : > { %s410_s16 = scalar_select %p409_p6, %s993_s30, 3 }
  0x12   : > { %s856_s17 = sshll.u32 %s1214_s10, 3  ;;  %s866_s18 = sshll.u32 %s1214_s10, 2 }
  0x13   : > { %s1101_s21 = scalar_lea.vmem %s1200_s0, %s856_s17  ;;  %s906_s22 = sshll.u32 %s410_s16, 4 }
  0x14   : > { %s1106_s25 = scalar_lea.vmem %s1201_s3, %s906_s22  ;;  %s1116_s10 = scalar_lea.vmem %s1186_s5, %s906_s22 }
  0x15   : > { %s1111_s28 = scalar_lea.vmem %s1202_s4, %s906_s22  ;;  %s909_s14 = sshll.u32 %s410_s16, 3 }
  0x16   : > { %s1121_s0 = scalar_lea.vmem %s1187_s6, %s909_s14  ;;  %s1126_s24 = scalar_lea.vmem %s1189_s8, %s856_s17 }
  0x17   : > { %s438_s3 = sadd.s32 %s866_s18, %s410_s16  ;;  %445 = sbr.rel (%p868_p7) target bundleno = 301 (0x12d), region = 56 }
  0x18   : > { %s867_s26 = sshll.u32 %s438_s3, 3 }
  0x19   : > { %s1131_s11 = scalar_lea.vmem %s1190_s9, %s867_s26 }
  0x1c   : > { %v446_v0 = vld [vmem:[%s1101_s21] sm:$0x1f]  ;;  %vm449_vm0 = vcmask 258048   ;;  %v1011_v2 = vmov 0.0   ;;  %v1012_v3 = vmov 32.0   ;;  %vm488_vm5 = vcmask 256000  }
  0x1d   : > { %v450_v1 = vsel %vm449_vm0, %v446_v0, 0.0  ;;  %494 = vst.msk [vmem:[#allocation3] sm:$0x1f] %vm449_vm0, %v1011_v2  ;;  %962 = vrcp.f32 %v1012_v3  ;;  %v960_v24 = vld [vmem:[%s1182_s1] ss:$0 sm:$0xff] }
  0x1e   : > { %451 = vadd.xlane.f32.xlu0 %v450_v1  ;;  %v961_v26 = vld [vmem:[%s1183_s2] ss:$0 sm:$0xff]  ;;  %vm489_vm6 = vsmask.f32 2304 }
  0x1f   : > { %vm490_vm7 = vmand %vm488_vm5, %vm489_vm6  ;;  %v491_v30 = vld [vmem:[#allocation2] sm:$0x7] }
  0x23   : > { %v963_v4 = vpop.eup %962 }
  0x24   : > { %v454_v5 = vmul.f32 32.0, %v963_v4  ;;  %vm458_vm1 = vweird.f32 %v963_v4 }
  0x26   : > { %v455_v6 = vsub.f32 1.0, %v454_v5 }
  0x28   : > { %v456_v7 = vmul.f32 %v963_v4, %v455_v6 }
  0x2a   : > { %v457_v8 = vadd.f32 %v963_v4, %v456_v7 }
  0x2c   : > { %v459_v9 = vsel %vm458_vm1, %v963_v4, %v457_v8 }
  0x91   : > { %v452_v10 = vpop.xlane.xlu0 %451 }
  0x92   : > { %v460_v11 = vmul.f32 %v459_v9, %v452_v10 }
  0x94   : > { %v461_v12 = vsub.f32 %v446_v0, %v460_v11 }
  0x96   : > { %v462_v13 = vmul.f32 %v461_v12, %v461_v12 }
  0x98   : > { %v463_v14 = vsel %vm449_vm0, %v462_v13, 0.0 }
  0x99   : > { %464 = vadd.xlane.f32.xlu0 %v463_v14 }
 0x10c   : > { %v465_v15 = vpop.xlane.xlu0 %464 }
 0x10d   : > { %v466_v16 = vmul.f32 %v465_v15, %v459_v9 }
 0x10f   : > { %v467_v17 = vadd.f32 1e-05, %v466_v16 }
 0x111   : > { %964 = vrsqrt.f32 %v467_v17  ;;  %vm474_vm3 = vweird.f32 %v467_v17 }
 0x117   : > { %v965_v18 = vpop.eup %964 }
 0x118   : > { %v469_v19 = vmul.f32 %v965_v18, %v467_v17  ;;  %vm475_vm2 = vweird.f32 %v965_v18 }
 0x119   : > { %vm476_vm4 = vmor %vm474_vm3, %vm475_vm2 }
 0x11a   : > { %v470_v20 = vmul.f32 %v965_v18, %v469_v19 }
 0x11c   : > { %v471_v21 = vmul.f32 0.5, %v470_v20 }
 0x11e   : > { %v472_v22 = vsub.f32 1.5, %v471_v21 }
 0x120   : > { %v473_v23 = vmul.f32 %v965_v18, %v472_v22 }
 0x122   : > { %v477_v25 = vsel %vm476_vm4, %v965_v18, %v473_v23 }
 0x123   : > { %v478_v27 = vmul.f32 %v477_v25, %v461_v12 }
 0x125   : > { %v482_v28 = vmul.f32 %v960_v24, %v478_v27 }
 0x127   : > { %v486_v29 = vadd.f32 %v961_v26, %v482_v28 }
 0x129   : > { %v487_v31 = vpack.c.bf16 %v486_v29, %v486_v29 }
 0x12b   : > { %v492_v32 = vsel %vm490_vm7, %v487_v31, %v491_v30 }
 0x12c   : > { %493 = vst [vmem:[#allocation2] sm:$0x7] %v492_v32 }
 0x12d PF: > { %v911_v33 = vld [vmem:[%s1106_s25 + $0x8] sm:$0xff]  ;;  %v910_v35 = vld [vmem:[%s1106_s25] sm:$0xff]  ;;  %vm512_vm8 = vcmask 261120   ;;  %vm590_vm9 = vcmask 130048   ;;  %vm610_vm10 = vcmask 36864   ;;  %vm628_vm11 = vcmask 1041408  }
 0x12e   : > { %v913_v34 = vld [vmem:[%s1111_s28 + $0x8] sm:$0xff]  ;;  %522 = vmatpush.bf16.msra.mxu0 %v911_v33  ;;  %v912_v36 = vld [vmem:[%s1111_s28] sm:$0xff]  ;;  %vm629_vm12 = vcmask 1042432   ;;  %v1013_v51 = vmov 65535   ;;  %vm624_vm13 = vcmask 39936   ;;  %vm648_vm14 = vcmask 126976  }
 0x12f   : > { %552 = vmatpush.bf16.msra.mxu1 %v913_v34  ;;  %v915_v46 = vld [vmem:[%s1116_s10 + $0x8] sm:$0xff]  ;;  %v914_v47 = vld [vmem:[%s1116_s10] sm:$0xff]  ;;  %v630_v52 = vsel %vm628_vm11, 4294967295, %v1013_v51  ;;  %vm677_vm15 = vcmask 258048   ;;  %p903_p8 = scmp.ne.s32.totalorder %s993_s30, 3 }
 0x130   : > { %581 = vmatpush.bf16.msra.mxu2 %v915_v46  ;;  %v631_v54 = vsel %vm629_vm12, %v630_v52, 0  ;;  %v916_v63 = vld [vmem:[%s1121_s0] sm:$0xff] }
 0x131   : > { %v650_v7 = vld [vmem:[#allocation3] sm:$0x1f] }
 0x132   : > { %523 = vmatpush.bf16.msra.mxu0 %v910_v35 }
 0x133   : > { %553 = vmatpush.bf16.msra.mxu1 %v912_v36  ;;  %v495_v37 = vld [vmem:[#allocation2] sm:$0x7] }
 0x134   : > { %582 = vmatpush.bf16.msra.mxu2 %v914_v47 }
 0x135   : > { %877 = vmatmul.msk.bf16.vlgmr.msra.gmra.mxu0 %vm512_vm8, %v495_v37 }
 0x136   : > { %886 = vmatmul.msk.bf16.vlgmr.msra.gmra.mxu1 %vm512_vm8, %v495_v37 }
 0x137   : > { %895 = vmatmul.msk.bf16.vlgmr.msra.gmra.mxu2 %vm512_vm8, %v495_v37  ;;  %670 = vmatpush.bf16.msrb.mxu1 %v916_v63 }
 0x1b2   : > { %v525_v38 = vpop.f32.mrf.mxu0 }
 0x1b3   : > { %v555_v39 = vpop.f32.mrf.mxu1  ;;  %v529_v41 = vmul.f32 0.25, %v525_v38 }
 0x1b4   : > { %v589_v40 = vpack.c.bf16 %v555_v39, %v555_v39 }
 0x1b5   : > { %v588_v43 = vpack.c.bf16 %v529_v41, %v529_v41 }
 0x1b6   : > { %v595_v42 = vsel %vm590_vm9, %v589_v40, 0 }
 0x1b7   : > { %604 = vmatpush.bf16.xpose.msra.mxu3 %v595_v42 }
 0x1ba   : > { %v527_v44 = vpop.f32.mrf.mxu0  ;;  %v584_v53 = vpop.f32.mrf.mxu2 }
 0x1bb   : > { %v557_v45 = vpop.f32.mrf.mxu1  ;;  %v623_v56 = vpack.c.bf16 %v584_v53, %v584_v53 }
 0x1bd   : > { %v633_v58 = vand.u32 %v631_v54, %v623_v56 }
 0x1be   : > { %896 = vmatmul.msk.bf16.vlgmr.msra.gmra.mxu3 %vm590_vm9, %v588_v43 }
 0x1bf   : > { %642 = vmatpush.bf16.msrb.mxu0 %v633_v58 }
 0x1c2   : > { %v586_v60 = vpop.f32.mrf.mxu2 }
 0x241   : > { %v606_v48 = vpop.f32.mrf.mxu3 }
 0x242   : > { %v611_v49 = vsel %vm610_vm10, %v606_v48, -inf }
 0x243   : > { %612 = vmax.xlane.f32.xlu0 %v611_v49 }
 0x249   : > { %v608_v50 = vpop.f32.mrf.mxu3 }
 0x2b6   : > { %v613_v55 = vpop.xlane.xlu0 %612 }
 0x2b7   : > { %v614_v57 = vsub.f32 %v606_v48, %v613_v55 }
 0x2b9   : > { %v615_v59 = vmul.f32 1.442695, %v614_v57 }
 0x2bb   : > { %966 = vpow2.f32 %v615_v59 }
 0x2c1   : > { %v967_v61 = vpop.eup %966 }
 0x2c2   : > { %v617_v62 = vsel %vm610_vm10, %v967_v61, 0.0 }
 0x2c3   : > { %618 = vadd.xlane.f32.xlu0 %v617_v62 }
 0x336   : > { %v619_v0 = vpop.xlane.xlu0 %618 }
 0x337   : > { %968 = vrcp.f32 %v619_v0 }
 0x33d   : > { %v969_v1 = vpop.eup %968 }
 0x33e   : > { %v621_v2 = vmul.f32 %v969_v1, %v967_v61 }
 0x340   : > { %v622_v3 = vpack.c.bf16 %v621_v2, %v621_v2 }
 0x342   : > { %897 = vmatmul.msk.bf16.vlgmr.msrb.gmra.mxu0 %vm624_vm13, %v622_v3 }
 0x3bf   : > { %v644_v4 = vpop.f32.mrf.mxu0 }
 0x3c0   : > { %649 = vst.msk [vmem:[%s1131_s11] sm:$0x1f] %vm648_vm14, %v644_v4  ;;  %v651_v5 = vpack.c.bf16 %v644_v4, %v644_v4 }
 0x3c2   : > { %902 = vmatmul.msk.bf16.vlgmr.msrb.gmra.mxu1 %vm590_vm9, %v651_v5 }
 0x3c7   : > { %v646_v6 = vpop.f32.mrf.mxu0 }
 0x43f   : > { %v672_v8 = vpop.f32.mrf.mxu1 }
 0x440   : > { %v676_v9 = vadd.f32 %v672_v8, %v650_v7 }
 0x442   : > { %678 = vst.msk [vmem:[#allocation3] sm:$0x1f] %vm677_vm15, %v676_v9 }
 0x443   : > { %682 = sbr.rel (%p903_p8) target bundleno = 1103 (0x44f), region = 60 }
 0x447   : > { %v674_v10 = vpop.f32.mrf.mxu1 }
 0x448   : > { %v970_v12 = vld [vmem:[%s1188_s7] ss:$0 sm:$0xff] }
 0x449   : > { %v683_v11 = vld [vmem:[#allocation3] sm:$0x1f] }
 0x44a   : > { %v689_v13 = vld [vmem:[%s1101_s21] sm:$0x1f]  ;;  %v688_v14 = vadd.f32 %v970_v12, %v683_v11 }
 0x44c   : > { %v690_v15 = vadd.f32 %v689_v13, %v688_v14 }
 0x44e   : > { %691 = vst.msk [vmem:[%s1126_s24] sm:$0x1f] %vm677_vm15, %v690_v15 }
 0x44f PF: > { %s20_s13 = sadd.s32 1, %s1009_s13   ;;  %s1203_s30 = sld [smem:[#allocation4_spill]] }
 0x450   : > { %p17_p9 = scmp.ge.s32.totalorder %s20_s13, 10   ;;  %s1204_s10 = sld [smem:[#allocation5_spill]] }
 0x451   : > { %s1205_s11 = sld [smem:[#allocation6_spill]] }
 0x452   : > { %s1206_s12 = sld [smem:[#allocation7_spill]]  ;;  %19 = sbr.rel (!%p17_p9) target bundleno = 4 (0x4), region = 114 }

// kernel: vit_forward.11
= control target key start
LH: loop header
LB: loop body
LE: loop exit
PB: predicated region body
PF: predicated region fallthrough
CT: control target
= control target key end

     0   :  { %vm24_vm0 = vcmask 261120   ;;  %v124_v2 = vmov 32.0   ;;  %vm99_vm5 = vcmask 80896   ;;  %s179_s0 = inlined_call_operand.vmem [shape: f32[8,32], index: 0, kind: input, shape index: {}]   ;;  %s180_s1 = inlined_call_operand.vmem [shape: f32[1,32], index: 1, kind: input, shape index: {}]   ;;  %s181_s2 = inlined_call_operand.vmem [shape: f32[1,32], index: 2, kind: input, shape index: {}]   ;;  %s182_s4 = inlined_call_operand.vmem [shape: f32[1,10], index: 4, kind: input, shape index: {}]   ;;  %s183_s3 = inlined_call_operand.vmem [shape: bf16[32,10], index: 3, kind: input, shape index: {}]   ;;  %s184_s5 = inlined_call_operand.vmem [shape: f32[8,10], index: 5, kind: output, shape index: {}]  }
   0x1   :  { %v21_v0 = vld [vmem:[%s179_s0] sm:$0xff]  ;;  %120 = vrcp.f32 %v124_v2  ;;  %v115_v14 = vld [vmem:[%s183_s3 + $0x8] sm:$0xff] }
   0x2   :  { %v25_v1 = vsel %vm24_vm0, %v21_v0, 0.0  ;;  %92 = vmatpush.bf16.msra.mxu0 %v115_v14  ;;  %v114_v15 = vld [vmem:[%s183_s3] sm:$0xff] }
   0x3   :  { %26 = vadd.xlane.f32.xlu0 %v25_v1  ;;  %v117_v25 = vld [vmem:[%s180_s1] ss:$0 sm:$0xff] }
   0x4   :  { %v118_v28 = vld [vmem:[%s181_s2] ss:$0 sm:$0xff] }
   0x5   :  { %v119_v32 = vld [vmem:[%s182_s4] ss:$0 sm:$0xff] }
   0x6   :  { %93 = vmatpush.bf16.msra.mxu0 %v114_v15 }
   0x7   :  { %v121_v3 = vpop.eup %120 }
   0x8   :  { %v29_v4 = vmul.f32 32.0, %v121_v3  ;;  %vm33_vm1 = vweird.f32 %v121_v3 }
   0xa   :  { %v30_v5 = vsub.f32 1.0, %v29_v4 }
   0xc   :  { %v31_v6 = vmul.f32 %v121_v3, %v30_v5 }
   0xe   :  { %v32_v7 = vadd.f32 %v121_v3, %v31_v6 }
  0x10   :  { %v34_v8 = vsel %vm33_vm1, %v121_v3, %v32_v7 }
  0x76   :  { %v27_v9 = vpop.xlane.xlu0 %26 }
  0x77   :  { %v35_v10 = vmul.f32 %v34_v8, %v27_v9 }
  0x79   :  { %v36_v11 = vsub.f32 %v21_v0, %v35_v10 }
  0x7b   :  { %v37_v12 = vmul.f32 %v36_v11, %v36_v11 }
  0x7d   :  { %v38_v13 = vsel %vm24_vm0, %v37_v12, 0.0 }
  0x7e   :  { %39 = vadd.xlane.f32.xlu0 %v38_v13 }
  0xf1   :  { %v40_v16 = vpop.xlane.xlu0 %39 }
  0xf2   :  { %v41_v17 = vmul.f32 %v40_v16, %v34_v8 }
  0xf4   :  { %v42_v18 = vadd.f32 1e-05, %v41_v17 }
  0xf6   :  { %122 = vrsqrt.f32 %v42_v18  ;;  %vm49_vm3 = vweird.f32 %v42_v18 }
  0xfc   :  { %v123_v19 = vpop.eup %122 }
  0xfd   :  { %v44_v20 = vmul.f32 %v123_v19, %v42_v18  ;;  %vm50_vm2 = vweird.f32 %v123_v19 }
  0xfe   :  { %vm51_vm4 = vmor %vm49_vm3, %vm50_vm2 }
  0xff   :  { %v45_v21 = vmul.f32 %v123_v19, %v44_v20 }
 0x101   :  { %v46_v22 = vmul.f32 0.5, %v45_v21 }
 0x103   :  { %v47_v23 = vsub.f32 1.5, %v46_v22 }
 0x105   :  { %v48_v24 = vmul.f32 %v123_v19, %v47_v23 }
 0x107   :  { %v52_v26 = vsel %vm51_vm4, %v123_v19, %v48_v24 }
 0x108   :  { %v53_v27 = vmul.f32 %v52_v26, %v36_v11 }
 0x10a   :  { %v57_v29 = vmul.f32 %v117_v25, %v53_v27 }
 0x10c   :  { %v61_v30 = vadd.f32 %v118_v28, %v57_v29 }
 0x10e   :  { %v62_v31 = vpack.c.bf16 %v61_v30, %v61_v30 }
 0x110   :  { %113 = vmatmul.msk.bf16.vlgmr.msra.gmra.mxu0 %vm24_vm0, %v62_v31 }
 0x18d   :  { %v95_v33 = vpop.f32.mrf.mxu0 }
 0x18e   :  { %v96_v34 = vadd.f32 %v119_v32, %v95_v33 }
 0x190   :  { %100 = vst.msk [vmem:[%s184_s5] sm:$0xff] %vm99_vm5, %v96_v34 }
 0x195   :  { %v97_v35 = vpop.f32.mrf.mxu0 }

</bundles_post_ra>
